<compile_context>
chip_gen: v7x
topology: tpu7x:2x2x1
jax: 0.10.0
libtpu: 0.0.40
codegen_flags: <defaults>
</compile_context>

<pallas_src>
import jax
import jax.numpy as jnp
from jax.experimental import pallas as pl
from jax.experimental.pallas import tpu as pltpu

PAD_F = 128   # lane-dense padded feature width (last dim -> 128 lanes)
PAD_N = 128   # node-row padding multiple (sublane / MXU friendly)


def _tgcn_encoder_kernel(a_ref, x_ref, w_ref, b_ref, be_ref, out_ref):
    # a_ref  : (Np, Np)          bf16  normalized adjacency (padded rows/cols = 0)
    # x_ref  : (Np, PAD_F)       bf16  node features (zero-padded lanes/rows)
    # w_ref  : (4, PAD_F, PAD_F) bf16  per-layer weights (zero-padded)
    # b_ref  : (4, PAD_F)        f32   per-layer biases (zero-padded)
    # be_ref : (3, Np, PAD_F)    bf16  community residuals B_enc1..3 (zero-padded)
    # out_ref: (Np, PAD_F)       f32
    a32 = a_ref[...].astype(jnp.float32)   # upcast once; aggregation stays f32
    biases = b_ref[...]                    # (4, PAD_F) f32

    def gcn_layer(h16, layer):
        # Reassociated:  Â @ (h @ W) — feature projection first, aggregation second.
        p = jnp.dot(h16, w_ref[layer], preferred_element_type=jnp.float32)
        z = jnp.dot(a32, p, preferred_element_type=jnp.float32)
        # DGL GraphConv adds bias AFTER aggregation; elementwise math stays f32
        # (v5e has no bf16 VPU arithmetic).
        z = z + biases[layer:layer + 1, :]
        return jnp.maximum(z, 0.0)          # ReLU; dropout(p=0) == identity

    h = gcn_layer(x_ref[...], 0) + be_ref[0].astype(jnp.float32)          # + B_enc1
    h = gcn_layer(h.astype(jnp.bfloat16), 1) + be_ref[1].astype(jnp.float32)  # + B_enc2
    h = gcn_layer(h.astype(jnp.bfloat16), 2) + be_ref[2].astype(jnp.float32)  # + B_enc3
    out_ref[...] = gcn_layer(h.astype(jnp.bfloat16), 3).astype(out_ref.dtype)


def prepare_tgcn_inputs(a_norm, x, params, b_enc1, b_enc2, b_enc3):
    """Hoisted, call-once layout plumbing: pad + consolidate into slab inputs.

    Precompute these once for static weights / adjacency / residuals and reuse
    across forward passes; only the jitted pallas_call below is per-call work.
    """
    w1, b1, w2, b2, w3, b3, w4, b4 = params
    n = x.shape[0]
    n_out = w4.shape[1]
    for w in (w1, w2, w3, w4):
        assert max(w.shape) <= PAD_F, "feature dims must be <= PAD_F (=128)"
    assert x.shape[1] <= PAD_F
    n_pad = ((n + PAD_N - 1) // PAD_N) * PAD_N

    def pad2(m, rows, cols, dtype):
        out = jnp.zeros((rows, cols), jnp.float32)
        out = out.at[: m.shape[0], : m.shape[1]].set(m)
        return out.astype(dtype)

    def pad_b(b):
        out = jnp.zeros((PAD_F,), jnp.float32)
        return out.at[: b.shape[-1]].set(b.reshape(-1))

    w_slab = jnp.stack([pad2(w, PAD_F, PAD_F, jnp.bfloat16)
                        for w in (w1, w2, w3, w4)])                 # (4,128,128) bf16
    b_slab = jnp.stack([pad_b(b) for b in (b1, b2, b3, b4)])        # (4,128)     f32
    be_slab = jnp.stack([pad2(b, n_pad, PAD_F, jnp.bfloat16)
                         for b in (b_enc1, b_enc2, b_enc3)])        # (3,Np,128)  bf16
    x_pad = pad2(x, n_pad, PAD_F, jnp.bfloat16)                     # (Np,128)    bf16
    # NOTE: padded rows/cols of Â MUST stay zero — that is what keeps the fake
    # padded node rows from contaminating real rows through the aggregation.
    a16 = pad2(a_norm, n_pad, n_pad, jnp.bfloat16)                  # (Np,Np)     bf16
    return (a16, x_pad, w_slab, b_slab, be_slab), (n, n_out)


@jax.jit
def tgcn_encoder_padded(a16, x16, w_slab, b_slab, be_slab):
    """Hot path: single fused, fully VMEM-resident pallas_call on padded slabs."""
    n_pad = a16.shape[0]
    inputs = (a16, x16, w_slab, b_slab, be_slab)

    def full_spec(shape):
        nd = len(shape)
        # grid=(1,): double-buffering buys nothing, so single-buffer every block.
        return pl.BlockSpec(shape, lambda i, _nd=nd: (0,) * _nd,
                            pipeline_mode=pl.Buffered(1))

    total_bytes = sum(int(v.size) * v.dtype.itemsize for v in inputs)
    total_bytes += n_pad * PAD_F * 4                       # f32 output block
    vmem_limit = int(2 * total_bytes) + (2 << 20)          # generous headroom

    return pl.pallas_call(
        _tgcn_encoder_kernel,
        grid=(1,),
        in_specs=[full_spec(v.shape) for v in inputs],
        out_specs=full_spec((n_pad, PAD_F)),
        out_shape=jax.ShapeDtypeStruct((n_pad, PAD_F), jnp.float32),
        compiler_params=pltpu.CompilerParams(
            dimension_semantics=("arbitrary",),
            vmem_limit_bytes=vmem_limit),
    )(*inputs)


def tgcn_encoder(a_norm, x, params, b_enc1, b_enc2, b_enc3):
    """Convenience one-shot wrapper (prepare + run + slice)."""
    slabs, (n, n_out) = prepare_tgcn_inputs(a_norm, x, params,
                                            b_enc1, b_enc2, b_enc3)
    out_pad = tgcn_encoder_padded(*slabs)
    # Slice padded node rows and padded feature lanes back off.
    return out_pad[:n, :n_out]


def xavier_uniform(key, fan_in, fan_out):
    bound = (6.0 / (fan_in + fan_out)) ** 0.5
    return jax.random.uniform(key, (fan_in, fan_out), jnp.float32, -bound, bound)


def reference_forward(a_norm, x, params, b_enc1, b_enc2, b_enc3):
    w1, b1, w2, b2, w3, b3, w4, b4 = params
    layer = lambda h, w, b: jnp.maximum(a_norm @ h @ w + b, 0.0)
    h = layer(x, w1, b1) + b_enc1
    h = layer(h, w2, b2) + b_enc2
    h = layer(h, w3, b3) + b_enc3
    return layer(h, w4, b4)


if __name__ == "__main__":
    # Small shapes consistent with the module.
    N = 64            # number of graph nodes
    in_feats = 32
    n_enc_1, n_enc_2, n_enc_3 = 32, 16, 16
    dropout = 0.0     # identity dropout -> exact deterministic semantics

    key = jax.random.PRNGKey(0)
    keys = jax.random.split(key, 12)

    # --- deterministic graph: random symmetric adjacency + self-loops, norm='both'
    adj = (jax.random.uniform(keys[0], (N, N)) < 0.1).astype(jnp.float32)
    adj = jnp.maximum(adj, adj.T)
    adj = jnp.maximum(adj, jnp.eye(N, dtype=jnp.float32))   # avoid zero in-degree
    deg = adj.sum(axis=1)
    d_inv_sqrt = 1.0 / jnp.sqrt(deg)
    a_norm = adj * d_inv_sqrt[:, None] * d_inv_sqrt[None, :]

    # --- node features and community residuals (B_enc*)
    x = jax.random.normal(keys[1], (N, in_feats), jnp.float32)
    b_enc1 = jax.random.normal(keys[2], (N, n_enc_1), jnp.float32)
    b_enc2 = jax.random.normal(keys[3], (N, n_enc_2), jnp.float32)
    b_enc3 = jax.random.normal(keys[4], (N, n_enc_3), jnp.float32)

    # --- deterministic xavier-uniform weights, zero biases (biases kept 2D (1, F))
    params = (
        xavier_uniform(keys[5], in_feats, n_enc_1), jnp.zeros((1, n_enc_1), jnp.float32),
        xavier_uniform(keys[6], n_enc_1, n_enc_2), jnp.zeros((1, n_enc_2), jnp.float32),
        xavier_uniform(keys[7], n_enc_2, n_enc_3), jnp.zeros((1, n_enc_3), jnp.float32),
        xavier_uniform(keys[8], n_enc_3, n_enc_3), jnp.zeros((1, n_enc_3), jnp.float32),
    )

    # Hoisted prep: build padded slabs ONCE (static graph / weights / residuals),
    # then only the jitted pallas_call runs per forward pass.
    slabs, (n_rows, n_out) = prepare_tgcn_inputs(a_norm, x, params,
                                                 b_enc1, b_enc2, b_enc3)
    z_pad = tgcn_encoder_padded(*slabs)
    z_pad = jax.block_until_ready(z_pad)
    z = z_pad[:n_rows, :n_out]

    z_ref = reference_forward(a_norm, x, params, b_enc1, b_enc2, b_enc3)
    assert z.shape == (N, n_enc_3)
    # Â / x / W / B_enc are shipped as bf16 (f32 accumulation + f32 aggregation
    # in-kernel): expect ~1e-2 error; keep a safe tolerance.
    assert jnp.allclose(z, z_ref, atol=1e-1, rtol=1e-1)

    print("KERNEL_OK")
</pallas_src>

<mosaic_0001>
module attributes {stable_mosaic.version = 11 : i64} {
  func.func @_tgcn_encoder_kernel(%arg0: i32, %arg1: memref<128x128xbf16, #tpu.memory_space<vmem>>, %arg2: memref<128x128xbf16, #tpu.memory_space<vmem>>, %arg3: memref<4x128x128xbf16, #tpu.memory_space<vmem>>, %arg4: memref<4x128xf32, #tpu.memory_space<vmem>>, %arg5: memref<3x128x128xbf16, #tpu.memory_space<vmem>>, %arg6: memref<128x128xf32, #tpu.memory_space<vmem>>) attributes {dimension_semantics = [#tpu.dimension_semantics<arbitrary>], iteration_bounds = array<i64: 1>, scalar_prefetch = 0 : i64, scratch_operands = 0 : i64, tpu.core_type = #tpu.core_type<tc>, window_params = [{pipeline_mode = #tpu.pipeline_mode<synchronous>, transform_indices = @transform_0, window_bounds = array<i64: 128, 128>}, {pipeline_mode = #tpu.pipeline_mode<synchronous>, transform_indices = @transform_1, window_bounds = array<i64: 128, 128>}, {pipeline_mode = #tpu.pipeline_mode<synchronous>, transform_indices = @transform_2, window_bounds = array<i64: 4, 128, 128>}, {pipeline_mode = #tpu.pipeline_mode<synchronous>, transform_indices = @transform_3, window_bounds = array<i64: 4, 128>}, {pipeline_mode = #tpu.pipeline_mode<synchronous>, transform_indices = @transform_4, window_bounds = array<i64: 3, 128, 128>}, {pipeline_mode = #tpu.pipeline_mode<synchronous>, transform_indices = @transform_5, window_bounds = array<i64: 128, 128>}]} {
    %c0 = arith.constant 0 : index
    %c0_0 = arith.constant 0 : index
    %0 = vector.load %arg1[%c0, %c0_0] : memref<128x128xbf16, #tpu.memory_space<vmem>>, vector<128x128xbf16>
    %1 = arith.extf %0 : vector<128x128xbf16> to vector<128x128xf32>
    %c0_1 = arith.constant 0 : index
    %c0_2 = arith.constant 0 : index
    %2 = vector.load %arg4[%c0_1, %c0_2] : memref<4x128xf32, #tpu.memory_space<vmem>>, vector<4x128xf32>
    %c0_3 = arith.constant 0 : index
    %c0_4 = arith.constant 0 : index
    %3 = vector.load %arg2[%c0_3, %c0_4] : memref<128x128xbf16, #tpu.memory_space<vmem>>, vector<128x128xbf16>
    %c0_5 = arith.constant 0 : index
    %c0_6 = arith.constant 0 : index
    %c0_7 = arith.constant 0 : index
    %4 = vector.load %arg3[%c0_5, %c0_6, %c0_7] : memref<4x128x128xbf16, #tpu.memory_space<vmem>>, vector<1x128x128xbf16>
    %5 = vector.shape_cast %4 : vector<1x128x128xbf16> to vector<128x128xbf16>
    %cst = arith.constant dense<0.000000e+00> : vector<128x128xf32>
    %6 = tpu.matmul %3, %5, %cst {dimension_numbers = #tpu.dot_dimension_numbers<[1], [0], [0], [1], [0, 0, 1, 1], [], []>} : vector<128x128xbf16>, vector<128x128xbf16>, vector<128x128xf32> -> vector<128x128xf32>
    %cst_8 = arith.constant dense<0.000000e+00> : vector<128x128xf32>
    %7 = tpu.matmul %1, %6, %cst_8 {dimension_numbers = #tpu.dot_dimension_numbers<[1], [0], [0], [1], [0, 0, 1, 1], [], []>} : vector<128x128xf32>, vector<128x128xf32>, vector<128x128xf32> -> vector<128x128xf32>
    %8 = vector.extract_strided_slice %2 {offsets = [0, 0], sizes = [1, 128], strides = [1, 1]} : vector<4x128xf32> to vector<1x128xf32>
    %9 = vector.broadcast %8 : vector<1x128xf32> to vector<128x128xf32>
    %10 = arith.addf %7, %9 : vector<128x128xf32>
    %cst_9 = arith.constant 0.000000e+00 : f32
    %11 = vector.broadcast %cst_9 : f32 to vector<128x128xf32>
    %12 = arith.maximumf %10, %11 : vector<128x128xf32>
    %c0_10 = arith.constant 0 : index
    %c0_11 = arith.constant 0 : index
    %c0_12 = arith.constant 0 : index
    %13 = vector.load %arg5[%c0_10, %c0_11, %c0_12] : memref<3x128x128xbf16, #tpu.memory_space<vmem>>, vector<1x128x128xbf16>
    %14 = vector.shape_cast %13 : vector<1x128x128xbf16> to vector<128x128xbf16>
    %15 = arith.extf %14 : vector<128x128xbf16> to vector<128x128xf32>
    %16 = arith.addf %12, %15 : vector<128x128xf32>
    %17 = arith.truncf %16 : vector<128x128xf32> to vector<128x128xbf16>
    %c1 = arith.constant 1 : index
    %c0_13 = arith.constant 0 : index
    %c0_14 = arith.constant 0 : index
    %18 = vector.load %arg3[%c1, %c0_13, %c0_14] : memref<4x128x128xbf16, #tpu.memory_space<vmem>>, vector<1x128x128xbf16>
    %19 = vector.shape_cast %18 : vector<1x128x128xbf16> to vector<128x128xbf16>
    %cst_15 = arith.constant dense<0.000000e+00> : vector<128x128xf32>
    %20 = tpu.matmul %17, %19, %cst_15 {dimension_numbers = #tpu.dot_dimension_numbers<[1], [0], [0], [1], [0, 0, 1, 1], [], []>} : vector<128x128xbf16>, vector<128x128xbf16>, vector<128x128xf32> -> vector<128x128xf32>
    %cst_16 = arith.constant dense<0.000000e+00> : vector<128x128xf32>
    %21 = tpu.matmul %1, %20, %cst_16 {dimension_numbers = #tpu.dot_dimension_numbers<[1], [0], [0], [1], [0, 0, 1, 1], [], []>} : vector<128x128xf32>, vector<128x128xf32>, vector<128x128xf32> -> vector<128x128xf32>
    %22 = vector.extract_strided_slice %2 {offsets = [1, 0], sizes = [1, 128], strides = [1, 1]} : vector<4x128xf32> to vector<1x128xf32>
    %23 = vector.broadcast %22 : vector<1x128xf32> to vector<128x128xf32>
    %24 = arith.addf %21, %23 : vector<128x128xf32>
    %cst_17 = arith.constant 0.000000e+00 : f32
    %25 = vector.broadcast %cst_17 : f32 to vector<128x128xf32>
    %26 = arith.maximumf %24, %25 : vector<128x128xf32>
    %c1_18 = arith.constant 1 : index
    %c0_19 = arith.constant 0 : index
    %c0_20 = arith.constant 0 : index
    %27 = vector.load %arg5[%c1_18, %c0_19, %c0_20] : memref<3x128x128xbf16, #tpu.memory_space<vmem>>, vector<1x128x128xbf16>
    %28 = vector.shape_cast %27 : vector<1x128x128xbf16> to vector<128x128xbf16>
    %29 = arith.extf %28 : vector<128x128xbf16> to vector<128x128xf32>
    %30 = arith.addf %26, %29 : vector<128x128xf32>
    %31 = arith.truncf %30 : vector<128x128xf32> to vector<128x128xbf16>
    %c2 = arith.constant 2 : index
    %c0_21 = arith.constant 0 : index
    %c0_22 = arith.constant 0 : index
    %32 = vector.load %arg3[%c2, %c0_21, %c0_22] : memref<4x128x128xbf16, #tpu.memory_space<vmem>>, vector<1x128x128xbf16>
    %33 = vector.shape_cast %32 : vector<1x128x128xbf16> to vector<128x128xbf16>
    %cst_23 = arith.constant dense<0.000000e+00> : vector<128x128xf32>
    %34 = tpu.matmul %31, %33, %cst_23 {dimension_numbers = #tpu.dot_dimension_numbers<[1], [0], [0], [1], [0, 0, 1, 1], [], []>} : vector<128x128xbf16>, vector<128x128xbf16>, vector<128x128xf32> -> vector<128x128xf32>
    %cst_24 = arith.constant dense<0.000000e+00> : vector<128x128xf32>
    %35 = tpu.matmul %1, %34, %cst_24 {dimension_numbers = #tpu.dot_dimension_numbers<[1], [0], [0], [1], [0, 0, 1, 1], [], []>} : vector<128x128xf32>, vector<128x128xf32>, vector<128x128xf32> -> vector<128x128xf32>
    %36 = vector.extract_strided_slice %2 {offsets = [2, 0], sizes = [1, 128], strides = [1, 1]} : vector<4x128xf32> to vector<1x128xf32>
    %37 = vector.broadcast %36 : vector<1x128xf32> to vector<128x128xf32>
    %38 = arith.addf %35, %37 : vector<128x128xf32>
    %cst_25 = arith.constant 0.000000e+00 : f32
    %39 = vector.broadcast %cst_25 : f32 to vector<128x128xf32>
    %40 = arith.maximumf %38, %39 : vector<128x128xf32>
    %c2_26 = arith.constant 2 : index
    %c0_27 = arith.constant 0 : index
    %c0_28 = arith.constant 0 : index
    %41 = vector.load %arg5[%c2_26, %c0_27, %c0_28] : memref<3x128x128xbf16, #tpu.memory_space<vmem>>, vector<1x128x128xbf16>
    %42 = vector.shape_cast %41 : vector<1x128x128xbf16> to vector<128x128xbf16>
    %43 = arith.extf %42 : vector<128x128xbf16> to vector<128x128xf32>
    %44 = arith.addf %40, %43 : vector<128x128xf32>
    %45 = arith.truncf %44 : vector<128x128xf32> to vector<128x128xbf16>
    %c3 = arith.constant 3 : index
    %c0_29 = arith.constant 0 : index
    %c0_30 = arith.constant 0 : index
    %46 = vector.load %arg3[%c3, %c0_29, %c0_30] : memref<4x128x128xbf16, #tpu.memory_space<vmem>>, vector<1x128x128xbf16>
    %47 = vector.shape_cast %46 : vector<1x128x128xbf16> to vector<128x128xbf16>
    %cst_31 = arith.constant dense<0.000000e+00> : vector<128x128xf32>
    %48 = tpu.matmul %45, %47, %cst_31 {dimension_numbers = #tpu.dot_dimension_numbers<[1], [0], [0], [1], [0, 0, 1, 1], [], []>} : vector<128x128xbf16>, vector<128x128xbf16>, vector<128x128xf32> -> vector<128x128xf32>
    %cst_32 = arith.constant dense<0.000000e+00> : vector<128x128xf32>
    %49 = tpu.matmul %1, %48, %cst_32 {dimension_numbers = #tpu.dot_dimension_numbers<[1], [0], [0], [1], [0, 0, 1, 1], [], []>} : vector<128x128xf32>, vector<128x128xf32>, vector<128x128xf32> -> vector<128x128xf32>
    %50 = vector.extract_strided_slice %2 {offsets = [3, 0], sizes = [1, 128], strides = [1, 1]} : vector<4x128xf32> to vector<1x128xf32>
    %51 = vector.broadcast %50 : vector<1x128xf32> to vector<128x128xf32>
    %52 = arith.addf %49, %51 : vector<128x128xf32>
    %cst_33 = arith.constant 0.000000e+00 : f32
    %53 = vector.broadcast %cst_33 : f32 to vector<128x128xf32>
    %54 = arith.maximumf %52, %53 : vector<128x128xf32>
    %c0_34 = arith.constant 0 : index
    %c0_35 = arith.constant 0 : index
    %55 = vector.load %arg6[%c0_34, %c0_35] : memref<128x128xf32, #tpu.memory_space<vmem>>, vector<128x128xf32>
    tpu.vector_store %arg6[%c0_34, %c0_35], %54 {strides = array<i32>} : memref<128x128xf32, #tpu.memory_space<vmem>>, vector<128x128xf32>,
    return
  }
  func.func @transform_0(%arg0: i32) -> (i32, i32) {
    %c0_i32 = arith.constant 0 : i32
    %c0_i32_0 = arith.constant 0 : i32
    %c0_i32_1 = arith.constant 0 : i32
    return %c0_i32, %c0_i32_0 : i32, i32
  }
  func.func @transform_1(%arg0: i32) -> (i32, i32) {
    %c0_i32 = arith.constant 0 : i32
    %c0_i32_0 = arith.constant 0 : i32
    %c0_i32_1 = arith.constant 0 : i32
    return %c0_i32, %c0_i32_0 : i32, i32
  }
  func.func @transform_2(%arg0: i32) -> (i32, i32, i32) {
    %c0_i32 = arith.constant 0 : i32
    %c0_i32_0 = arith.constant 0 : i32
    %c0_i32_1 = arith.constant 0 : i32
    %c0_i32_2 = arith.constant 0 : i32
    return %c0_i32, %c0_i32_0, %c0_i32_1 : i32, i32, i32
  }
  func.func @transform_3(%arg0: i32) -> (i32, i32) {
    %c0_i32 = arith.constant 0 : i32
    %c0_i32_0 = arith.constant 0 : i32
    %c0_i32_1 = arith.constant 0 : i32
    return %c0_i32, %c0_i32_0 : i32, i32
  }
  func.func @transform_4(%arg0: i32) -> (i32, i32, i32) {
    %c0_i32 = arith.constant 0 : i32
    %c0_i32_0 = arith.constant 0 : i32
    %c0_i32_1 = arith.constant 0 : i32
    %c0_i32_2 = arith.constant 0 : i32
    return %c0_i32, %c0_i32_0, %c0_i32_1 : i32, i32, i32
  }
  func.func @transform_5(%arg0: i32) -> (i32, i32) {
    %c0_i32 = arith.constant 0 : i32
    %c0_i32_0 = arith.constant 0 : i32
    %c0_i32_1 = arith.constant 0 : i32
    return %c0_i32, %c0_i32_0 : i32, i32
  }
}

</mosaic_0001>

<bundles_post_ra>
// kernel: tgcn_encoder_padded.1
= control target key start
LH: loop header
LB: loop body
LE: loop exit
PB: predicated region body
PF: predicated region fallthrough
CT: control target
= control target key end

     0   :  { %10 = vsyncpa [#allocation3], 0  ;;  %s3014_s0 = inlined_call_operand.hbm [shape: bf16[128,128], index: 0, kind: input, shape index: {}]   ;;  %s3015_s1 = inlined_call_operand.hbm [shape: bf16[128,128], index: 1, kind: input, shape index: {}]   ;;  %s3016_s2 = inlined_call_operand.hbm [shape: bf16[4,128,128], index: 2, kind: input, shape index: {}]   ;;  %s3017_s3 = inlined_call_operand.vmem [shape: f32[4,128], index: 3, kind: input, shape index: {}]   ;;  %s3018_s4 = inlined_call_operand.hbm [shape: bf16[3,128,128], index: 4, kind: input, shape index: {}]   ;;  %s3019_s5 = inlined_call_operand.hbm [shape: f32[128,128], index: 5, kind: output, shape index: {}]  }
   0x1   :  { %11 = vsyncpa [#allocation6], 0 }
   0x2   :  { %12 = vsyncpa [#allocation9], 0 }
   0x3   :  { %13 = vsyncpa [#allocation4], 0  ;;  %s2722_s18 = smov [#allocation5]   ;;  %s2723_s20 = smov [#allocation2]  }
   0x4   :  { %s31_s19 = sshll.u32 %s2722_s18, 4  ;;  %s19_s21 = sshll.u32 %s2723_s20, 4  ;;  %s32_s19 = int_to_ptr.vmem [resolvable:$true] %s31_s19  ;;  %s2761_s21 = int_to_ptr.vmem [resolvable:$true] %s19_s21 }
   0x5   :  { %s2604_s24 = scalar_lea.hbm %s3015_s1, 1024 }
   0x6   :  { %p2605_p0 = scmp.ne.s32.totalorder %s3015_s1, %s2604_s24  ;;  %p2608_p1 = scmp.lt.u32.totalorder %s2604_s24, %s3015_s1 }
   0x8   :  { %p2610_p2 = pnand %p2608_p1, %p2605_p0 }
   0xa   :  { %2613 = shalt.err (!%p2610_p2)
}
   0xb   :  { %s2614_s29 = scalar_lea.vmem %s32_s19, 1024  ;;  %p2619_p4 = scmp.lt.s32.totalorder %s32_s19, %s32_s19 }
   0xc   :  { %p2615_p3 = scmp.ne.s32.totalorder %s32_s19, %s2614_s29  ;;  %p2620_p5 = scmp.lt.s32.totalorder %s2614_s29, %s2614_s29 }
   0xe   :  { %p2621_p6 = por %p2620_p5, %p2619_p4 }
  0x10   :  { %p2622_p7 = pnand %p2621_p6, %p2615_p3 }
  0x12   :  { %2625 = shalt.err (!%p2622_p7)
}
  0x13   :  { %s2724_s30 = smov 64   ;;  %s2725_s6 = smov 4  }
  0x14   :  { %37 = dma.hbm_to_vmem [thread:$0]  %s3015_s1, 1024, %s32_s19, [#allocation6], %s2724_s30, %s2724_s30, %s2725_s6  }
  0x15   :  { %s2626_s11 = scalar_lea.hbm %s3014_s0, 1024 }
  0x16   :  { %p2627_p8 = scmp.ne.s32.totalorder %s3014_s0, %s2626_s11  ;;  %p2630_p9 = scmp.lt.u32.totalorder %s2626_s11, %s3014_s0 }
  0x18   :  { %p2632_p10 = pnand %p2630_p9, %p2627_p8 }
  0x1a   :  { %2635 = shalt.err (!%p2632_p10)
}
  0x1b   :  { %s2636_s16 = scalar_lea.vmem %s2761_s21, 1024  ;;  %p2641_p12 = scmp.lt.s32.totalorder %s2761_s21, %s2761_s21 }
  0x1c   :  { %p2637_p11 = scmp.ne.s32.totalorder %s2761_s21, %s2636_s16  ;;  %p2642_p13 = scmp.lt.s32.totalorder %s2636_s16, %s2636_s16 }
  0x1e   :  { %p2643_p0 = por %p2642_p13, %p2641_p12 }
  0x20   :  { %p2644_p1 = pnand %p2643_p0, %p2637_p11 }
  0x22   :  { %2647 = shalt.err (!%p2644_p1)
}
  0x23   :  { %25 = dma.hbm_to_vmem [thread:$0]  %s3014_s0, 1024, %s2761_s21, [#allocation3], %s2724_s30, %s2724_s30, %s2725_s6  }
  0x24   :  { %s2726_s18 = smov [#allocation7]   ;;  %s2727_s20 = smov [#allocation8]  }
  0x25   :  { %s43_s19 = sshll.u32 %s2726_s18, 4  ;;  %s57_s22 = sshll.u32 %s2727_s20, 4  ;;  %s44_s19 = int_to_ptr.vmem [resolvable:$true] %s43_s19  ;;  %s2798_s22 = int_to_ptr.vmem [resolvable:$true] %s57_s22 }
  0x26   :  { %s2648_s25 = scalar_lea.hbm %s3016_s2, 4096 }
  0x27   :  { %p2649_p2 = scmp.ne.s32.totalorder %s3016_s2, %s2648_s25  ;;  %p2652_p3 = scmp.lt.u32.totalorder %s2648_s25, %s3016_s2 }
  0x29   :  { %p2654_p4 = pnand %p2652_p3, %p2649_p2 }
  0x2b   :  { %2657 = shalt.err (!%p2654_p4)
}
  0x2c   :  { %s2658_s0 = scalar_lea.vmem %s44_s19, 4096  ;;  %p2663_p6 = scmp.lt.s32.totalorder %s44_s19, %s44_s19 }
  0x2d   :  { %p2659_p5 = scmp.ne.s32.totalorder %s44_s19, %s2658_s0  ;;  %p2664_p7 = scmp.lt.s32.totalorder %s2658_s0, %s2658_s0 }
  0x2f   :  { %p2665_p8 = por %p2664_p7, %p2663_p6 }
  0x31   :  { %p2666_p9 = pnand %p2665_p8, %p2659_p5 }
  0x33   :  { %2669 = shalt.err (!%p2666_p9)
}
  0x34   :  { %49 = dma.hbm_to_vmem [thread:$0]  %s3016_s2, 4096, %s44_s19, [#allocation6], %s2724_s30, %s2724_s30, %s2725_s6  }
  0x35   :  { %s2670_s10 = scalar_lea.hbm %s3018_s4, 3072 }
  0x36   :  { %p2671_p10 = scmp.ne.s32.totalorder %s3018_s4, %s2670_s10  ;;  %p2674_p11 = scmp.lt.u32.totalorder %s2670_s10, %s3018_s4 }
  0x38   :  { %p2676_p12 = pnand %p2674_p11, %p2671_p10 }
  0x3a   :  { %2679 = shalt.err (!%p2676_p12)
}
  0x3b   :  { %s2680_s15 = scalar_lea.vmem %s2798_s22, 3072  ;;  %p2685_p0 = scmp.lt.s32.totalorder %s2798_s22, %s2798_s22 }
  0x3c   :  { %p2681_p13 = scmp.ne.s32.totalorder %s2798_s22, %s2680_s15  ;;  %p2686_p1 = scmp.lt.s32.totalorder %s2680_s15, %s2680_s15 }
  0x3e   :  { %p2687_p2 = por %p2686_p1, %p2685_p0 }
  0x40   :  { %p2688_p3 = pnand %p2687_p2, %p2681_p13 }
  0x42   :  { %2691 = shalt.err (!%p2688_p3)
}
  0x43   :  { %63 = dma.hbm_to_vmem [thread:$0]  %s3018_s4, 3072, %s2798_s22, [#allocation9], %s2724_s30, %s2724_s30, %s2725_s6  }
  0x44   :  { %2714 = dma.done.wait [#allocation3], 1024  }
  0x45   :  { %2715 = vsyncadd [#allocation3], 4294966272 }
  0x46   :  { %2716 = dma.done.wait [#allocation6], 5120  }
  0x47   :  { %2717 = vsyncadd [#allocation6], 4294962176 }
  0x48   :  { %2718 = dma.done.wait [#allocation9], 3072  }
  0x49   :  { %2719 = vsyncadd [#allocation9], 4294964224  ;;  %v2563_v0 = vld [vmem:[#allocation7] sm:$0xff]   ;;  %v2564_v1 = vld [vmem:[#allocation7 + $0x8] sm:$0xff]  }
  0x4a   :  { %2074 = vmatprep.subr.bf16.mxu0 %v2563_v0  ;;  %v2565_v2 = vld [vmem:[#allocation7 + $0x10] sm:$0xff]   ;;  %v2566_v3 = vld [vmem:[#allocation7 + $0x18] sm:$0xff]   ;;  %v2571_v4 = vld [vmem:[#allocation5] sm:$0xff]  }
  0x4b   :  { %2075 = vmatpush3.bf16.msra.mxu0 %v2563_v0  ;;  %2090 = vmatprep.mubr.bf16.mxu0 %v2571_v4  ;;  %v2567_v5 = vld [vmem:[#allocation7 + $0x20] sm:$0xff]   ;;  %v2568_v6 = vld [vmem:[#allocation7 + $0x28] sm:$0xff]   ;;  %v2569_v7 = vld [vmem:[#allocation7 + $0x30] sm:$0xff]  }
  0x4c   :  { %2076 = vmatprep.subr.bf16.mxu0 %v2564_v1  ;;  %v2570_v8 = vld [vmem:[#allocation7 + $0x38] sm:$0xff]   ;;  %v2572_v9 = vld [vmem:[#allocation5 + $0x8] sm:$0xff]   ;;  %v2573_v10 = vld [vmem:[#allocation5 + $0x10] sm:$0xff]  }
  0x4d   :  { %v2574_v11 = vld [vmem:[#allocation5 + $0x18] sm:$0xff]   ;;  %v2575_v12 = vld [vmem:[#allocation5 + $0x20] sm:$0xff]   ;;  %v2576_v13 = vld [vmem:[#allocation5 + $0x28] sm:$0xff]  }
  0x4e   :  { %v2577_v14 = vld [vmem:[#allocation5 + $0x30] sm:$0xff]   ;;  %v2578_v15 = vld [vmem:[#allocation5 + $0x38] sm:$0xff]   ;;  %v1727_v16 = vld [vmem:[#allocation2] sm:$0xff]  }
  0x4f   :  { %2077 = vmatpush3.bf16.msra.mxu0 %v2564_v1  ;;  %v2835_v17 = vunpack.c.l.bf16 %v1727_v16  ;;  %v2579_v18 = vld [vmem:[#allocation7 + $0x40] sm:$0xff]   ;;  %v2580_v19 = vld [vmem:[#allocation7 + $0x48] sm:$0xff]   ;;  %v2581_v20 = vld [vmem:[#allocation7 + $0x50] sm:$0xff]   ;;  %v2838_v48 = vunpack.c.h.bf16 %v1727_v16 }
  0x50   :  { %2078 = vmatprep.subr.bf16.mxu0 %v2565_v2  ;;  %v2582_v21 = vld [vmem:[#allocation7 + $0x58] sm:$0xff]   ;;  %v2583_v22 = vld [vmem:[#allocation7 + $0x60] sm:$0xff]   ;;  %v1854_v47 = vld [vmem:[#allocation2 + $0x8] sm:$0xff]  }
  0x51   :  { %2138 = vmatprep.mubr.f32.mxu1 %v2835_v17  ;;  %v2840_v49 = vunpack.c.l.bf16 %v1854_v47  ;;  %v1855_v50 = vld [vmem:[#allocation2 + $0x10] sm:$0xff]   ;;  %v2843_v51 = vunpack.c.h.bf16 %v1854_v47  ;;  %v1856_v53 = vld [vmem:[#allocation2 + $0x18] sm:$0xff]   ;;  %v1857_v56 = vld [vmem:[#allocation2 + $0x20] sm:$0xff]  }
  0x52   :  { %v2846_v52 = vunpack.c.l.bf16 %v1855_v50  ;;  %v2849_v54 = vunpack.c.h.bf16 %v1855_v50  ;;  %v2852_v55 = vunpack.c.l.bf16 %v1856_v53  ;;  %v2855_v57 = vunpack.c.h.bf16 %v1856_v53  ;;  %v1858_v59 = vld [vmem:[#allocation2 + $0x28] sm:$0xff]   ;;  %v1859_v62 = vld [vmem:[#allocation2 + $0x30] sm:$0xff]   ;;  %v1860_v1 = vld [vmem:[#allocation2 + $0x38] sm:$0xff]  }
  0x53   :  { %2079 = vmatpush3.bf16.msra.mxu0 %v2565_v2  ;;  %v2858_v58 = vunpack.c.l.bf16 %v1857_v56  ;;  %v2861_v60 = vunpack.c.h.bf16 %v1857_v56  ;;  %v2864_v61 = vunpack.c.l.bf16 %v1858_v59  ;;  %v2867_v63 = vunpack.c.h.bf16 %v1858_v59 }
  0x54   :  { %2080 = vmatprep.subr.bf16.mxu0 %v2566_v3  ;;  %v2870_v0 = vunpack.c.l.bf16 %v1859_v62  ;;  %v2873_v2 = vunpack.c.h.bf16 %v1859_v62  ;;  %v2879_v4 = vunpack.c.h.bf16 %v1860_v1 }
  0x57   :  { %2081 = vmatpush3.bf16.msra.mxu0 %v2566_v3  ;;  %v2876_v3 = vunpack.c.l.bf16 %v1860_v1 }
  0x58   :  { %2082 = vmatprep.subr.bf16.mxu0 %v2567_v5 }
  0x5b   :  { %2083 = vmatpush3.bf16.msra.mxu0 %v2567_v5  ;;  %v2584_v5 = vld [vmem:[#allocation7 + $0x68] sm:$0xff]  }
  0x5c   :  { %2084 = vmatprep.subr.bf16.mxu0 %v2568_v6 }
  0x5f   :  { %2085 = vmatpush3.bf16.msra.mxu0 %v2568_v6  ;;  %v2585_v6 = vld [vmem:[#allocation7 + $0x70] sm:$0xff]  }
  0x60   :  { %2086 = vmatprep.subr.bf16.mxu0 %v2569_v7 }
  0x63   :  { %2087 = vmatpush3.bf16.msra.mxu0 %v2569_v7  ;;  %v2586_v7 = vld [vmem:[#allocation7 + $0x78] sm:$0xff]  }
  0x64   :  { %2088 = vmatprep.subr.bf16.mxu0 %v2570_v8 }
  0x67   :  { %2089 = vmatpush3.bf16.msra.mxu0 %v2570_v8  ;;  %v335_v8 = vlaneseq }
  0x68   :  { %2162 = vmatprep.subr.bf16.mxu0 %v2579_v18 }
  0x6a   :  { %2091 = vmatmul.mubr.bf16.vlgmr.msra.gmra.mrb[0].mxu0 %v2572_v9  ;;  %v2884_v9 = vshrl.u32 %v335_v8, 7 }
  0x6b   :  { %2094 = vmatprep.mubr.bf16.mxu0 %v2573_v10  ;;  %2163 = vmatpush3.bf16.msra.mxu0 %v2579_v18 }
  0x6c   :  { %2164 = vmatprep.subr.bf16.mxu0 %v2580_v19  ;;  %v337_v10 = vsub.s32 0, %v2884_v9 }
  0x6f   :  { %2165 = vmatpush3.bf16.msra.mxu0 %v2580_v19 }
  0x70   :  { %2166 = vmatprep.subr.bf16.mxu0 %v2581_v20 }
  0x72   :  { %2095 = vmatmul.mubr.bf16.gmra.mrb[4].mxu0 %v2574_v11  ;;  %v2890_v11 = vld [vmem:[%s3017_s3] sm:$0xf] }
  0x73   :  { %2098 = vmatprep.mubr.bf16.mxu0 %v2575_v12  ;;  %2167 = vmatpush3.bf16.msra.mxu0 %v2581_v20  ;;  %v2893_v12 = vrot.slane %v2890_v11, %v337_v10 }
  0x74   :  { %2168 = vmatprep.subr.bf16.mxu0 %v2582_v21 }
  0x77   :  { %2169 = vmatpush3.bf16.msra.mxu0 %v2582_v21  ;;  %v1861_v21 = vld [vmem:[#allocation8 + $0x8] sm:$0xff]  }
  0x78   :  { %2170 = vmatprep.subr.bf16.mxu0 %v2583_v22 }
  0x7a   :  { %2099 = vmatmul.mubr.bf16.gmra.mrb[8].mxu0 %v2576_v13  ;;  %v1759_v13 = vld [vmem:[#allocation8] sm:$0xff]  }
  0x7b   :  { %2102 = vmatprep.mubr.bf16.mxu0 %v2577_v14  ;;  %2171 = vmatpush3.bf16.msra.mxu0 %v2583_v22  ;;  %v1761_v16 = vunpack.c.h.bf16 %v1759_v13  ;;  %v1760_v20 = vunpack.c.l.bf16 %v1759_v13 }
  0x7c   :  { %2172 = vmatprep.subr.bf16.mxu0 %v2584_v5 }
  0x7f   :  { %2173 = vmatpush3.bf16.msra.mxu0 %v2584_v5 }
  0x80   :  { %2174 = vmatprep.subr.bf16.mxu0 %v2585_v6 }
  0x82   :  { %2103 = vmatmul.mubr.bf16.gmra.mrb[12].mxu0 %v2578_v15 }
  0x83   :  { %2175 = vmatpush3.bf16.msra.mxu0 %v2585_v6 }
  0x84   :  { %2176 = vmatprep.subr.bf16.mxu0 %v2586_v7 }
  0x87   :  { %2177 = vmatpush3.bf16.msra.mxu0 %v2586_v7  ;;  %v1864_v7 = vld [vmem:[#allocation8 + $0x20] sm:$0xff]  }
 0x13d   :  { %v2092_v23 = vpop.f32.mrb[0].mxu0 }
 0x13e   :  { %v272_v24 = vpop.f32.mrb[1].mxu0 }
 0x13f   :  { %v2093_v25 = vpop.f32.mrb[2].mxu0 }
 0x140   :  { %v2430_v26 = vpack.c.bf16 %v2093_v25, %v2092_v23  ;;  %v275_v27 = vpop.f32.mrb[3].mxu0 }
 0x141   :  { %v2426_v28 = vpack.c.bf16 %v275_v27, %v272_v24  ;;  %v1765_v27 = vunpack.c.h.bf16 %v1861_v21 }
 0x143   :  { %2427 = vmatprep.subr.bf16.mxu1 %v2426_v28 }
 0x144   :  { %2429 = vmatpush3.bf16.msra.mxu1 %v2426_v28 }
 0x145   :  { %v2096_v29 = vpop.f32.mrb[4].mxu0  ;;  %2431 = vmatprep.subr.bf16.mxu1 %v2430_v26 }
 0x146   :  { %v288_v30 = vpop.f32.mrb[5].mxu0 }
 0x147   :  { %v2097_v31 = vpop.f32.mrb[6].mxu0 }
 0x148   :  { %v2438_v32 = vpack.c.bf16 %v2097_v31, %v2096_v29  ;;  %v291_v33 = vpop.f32.mrb[7].mxu0  ;;  %2433 = vmatpush3.bf16.msra.mxu1 %v2430_v26  ;;  %v1764_v31 = vunpack.c.l.bf16 %v1861_v21 }
 0x149   :  { %v2434_v34 = vpack.c.bf16 %v291_v33, %v288_v30 }
 0x14b   :  { %2435 = vmatprep.subr.bf16.mxu1 %v2434_v34 }
 0x14c   :  { %2437 = vmatpush3.bf16.msra.mxu1 %v2434_v34 }
 0x14d   :  { %v2100_v35 = vpop.f32.mrb[8].mxu0  ;;  %2439 = vmatprep.subr.bf16.mxu1 %v2438_v32 }
 0x14e   :  { %v304_v36 = vpop.f32.mrb[9].mxu0 }
 0x14f   :  { %v2101_v37 = vpop.f32.mrb[10].mxu0 }
 0x150   :  { %v2446_v38 = vpack.c.bf16 %v2101_v37, %v2100_v35  ;;  %v307_v39 = vpop.f32.mrb[11].mxu0  ;;  %2441 = vmatpush3.bf16.msra.mxu1 %v2438_v32  ;;  %v1862_v32 = vld [vmem:[#allocation8 + $0x10] sm:$0xff]  }
 0x151   :  { %v2442_v40 = vpack.c.bf16 %v307_v39, %v304_v36  ;;  %v1769_v39 = vunpack.c.h.bf16 %v1862_v32 }
 0x153   :  { %2443 = vmatprep.subr.bf16.mxu1 %v2442_v40 }
 0x154   :  { %2445 = vmatpush3.bf16.msra.mxu1 %v2442_v40 }
 0x155   :  { %v2104_v41 = vpop.f32.mrb[12].mxu0  ;;  %2447 = vmatprep.subr.bf16.mxu1 %v2446_v38 }
 0x156   :  { %v320_v42 = vpop.f32.mrb[13].mxu0 }
 0x157   :  { %v2105_v43 = vpop.f32.mrb[14].mxu0 }
 0x158   :  { %v2454_v44 = vpack.c.bf16 %v2105_v43, %v2104_v41  ;;  %v323_v45 = vpop.f32.mrb[15].mxu0  ;;  %2449 = vmatpush3.bf16.msra.mxu1 %v2446_v38  ;;  %v1768_v43 = vunpack.c.l.bf16 %v1862_v32 }
 0x159   :  { %v2450_v46 = vpack.c.bf16 %v323_v45, %v320_v42 }
 0x15b   :  { %2451 = vmatprep.subr.bf16.mxu1 %v2450_v46 }
 0x15c   :  { %2453 = vmatpush3.bf16.msra.mxu1 %v2450_v46 }
 0x15d   :  { %2455 = vmatprep.subr.bf16.mxu1 %v2454_v44 }
 0x160   :  { %2457 = vmatpush3.bf16.msra.mxu1 %v2454_v44  ;;  %v1863_v44 = vld [vmem:[#allocation8 + $0x18] sm:$0xff]  }
 0x161   :  { %v1773_v59 = vunpack.c.h.bf16 %v1863_v44  ;;  %v1772_v6 = vunpack.c.l.bf16 %v1863_v44 }
 0x163   :  { %2139 = vmatmul.mubr.f32.vlgmr.msra.gmra.mrb[0].mxu1 %v2838_v48 }
 0x164   :  { %2141 = vmatprep.mubr.f32.mxu1 %v2840_v49 }
 0x167   :  { %2142 = vmatmul.mubr.f32.gmra.mrb[2].mxu1 %v2843_v51 }
 0x168   :  { %2144 = vmatprep.mubr.f32.mxu1 %v2846_v52 }
 0x16b   :  { %2145 = vmatmul.mubr.f32.gmra.mrb[4].mxu1 %v2849_v54 }
 0x16c   :  { %2147 = vmatprep.mubr.f32.mxu1 %v2852_v55 }
 0x16f   :  { %2148 = vmatmul.mubr.f32.gmra.mrb[6].mxu1 %v2855_v57 }
 0x170   :  { %2150 = vmatprep.mubr.f32.mxu1 %v2858_v58 }
 0x173   :  { %2151 = vmatmul.mubr.f32.gmra.mrb[8].mxu1 %v2861_v60 }
 0x174   :  { %2153 = vmatprep.mubr.f32.mxu1 %v2864_v61 }
 0x177   :  { %2154 = vmatmul.mubr.f32.gmra.mrb[10].mxu1 %v2867_v63 }
 0x178   :  { %2156 = vmatprep.mubr.f32.mxu1 %v2870_v0 }
 0x17b   :  { %2157 = vmatmul.mubr.f32.gmra.mrb[12].mxu1 %v2873_v2 }
 0x17c   :  { %2159 = vmatprep.mubr.f32.mxu1 %v2876_v3 }
 0x17f   :  { %2160 = vmatmul.mubr.f32.gmra.mrb[14].mxu1 %v2879_v4 }
 0x180   :  { %2226 = vmatprep.mubr.f32.mxu1 %v2835_v17 }
 0x236   :  { %v2140_v14 = vpop.f32.mrb[0].mxu1 }
 0x237   :  { %v411_v15 = vadd.f32 %v2140_v14, %v2893_v12  ;;  %v405_v18 = vpop.f32.mrb[1].mxu1 }
 0x238   :  { %v406_v19 = vadd.f32 %v405_v18, %v2893_v12  ;;  %v1777_v18 = vunpack.c.h.bf16 %v1864_v7 }
 0x239   :  { %v485_v22 = vmax.f32 %v411_v15, 0.0 }
 0x23a   :  { %v484_v23 = vmax.f32 %v406_v19, 0.0  ;;  %v2143_v24 = vpop.f32.mrb[2].mxu1 }
 0x23b   :  { %v533_v25 = vadd.f32 %v1761_v16, %v485_v22  ;;  %v421_v26 = vadd.f32 %v2143_v24, %v2893_v12  ;;  %v415_v28 = vpop.f32.mrb[3].mxu1  ;;  %v1776_v22 = vunpack.c.l.bf16 %v1864_v7 }
 0x23c   :  { %v532_v29 = vadd.f32 %v1760_v20, %v484_v23  ;;  %v416_v30 = vadd.f32 %v415_v28, %v2893_v12  ;;  %v1865_v23 = vld [vmem:[#allocation8 + $0x28] sm:$0xff]  }
 0x23d   :  { %v487_v33 = vmax.f32 %v421_v26, 0.0 }
 0x23e   :  { %v486_v34 = vmax.f32 %v416_v30, 0.0  ;;  %v2146_v35 = vpop.f32.mrb[4].mxu1  ;;  %v548_v36 = vpack.c.bf16 %v533_v25, %v532_v29  ;;  %v1781_v30 = vunpack.c.h.bf16 %v1865_v23 }
 0x23f   :  { %v535_v37 = vadd.f32 %v1765_v27, %v487_v33  ;;  %v431_v38 = vadd.f32 %v2146_v35, %v2893_v12  ;;  %v425_v40 = vpop.f32.mrb[5].mxu1  ;;  %v1866_v35 = vld [vmem:[#allocation8 + $0x30] sm:$0xff]  }
 0x240   :  { %v534_v41 = vadd.f32 %v1764_v31, %v486_v34  ;;  %v426_v42 = vadd.f32 %v425_v40, %v2893_v12  ;;  %2178 = vmatprep.mubr.bf16.mxu0 %v548_v36  ;;  %v1780_v34 = vunpack.c.l.bf16 %v1865_v23  ;;  %v2590_v23 = vld [vmem:[#allocation7 + $0x98] sm:$0xff]  }
 0x241   :  { %v489_v45 = vmax.f32 %v431_v38, 0.0 }
 0x242   :  { %v549_v46 = vpack.c.bf16 %v535_v37, %v534_v41  ;;  %v488_v47 = vmax.f32 %v426_v42, 0.0  ;;  %v2149_v50 = vpop.f32.mrb[6].mxu1  ;;  %v1785_v42 = vunpack.c.h.bf16 %v1866_v35 }
 0x243   :  { %v537_v53 = vadd.f32 %v1769_v39, %v489_v45  ;;  %v441_v56 = vadd.f32 %v2149_v50, %v2893_v12  ;;  %v435_v62 = vpop.f32.mrb[7].mxu1 }
 0x244   :  { %v536_v1 = vadd.f32 %v1768_v43, %v488_v47  ;;  %v436_v5 = vadd.f32 %v435_v62, %v2893_v12  ;;  %2179 = vmatmul.mubr.bf16.vlgmr.msra.gmra.mrb[16].mxu0 %v549_v46  ;;  %v1784_v46 = vunpack.c.l.bf16 %v1866_v35  ;;  %v1867_v47 = vld [vmem:[#allocation8 + $0x38] sm:$0xff]  }
 0x245   :  { %v491_v8 = vmax.f32 %v441_v56, 0.0 }
 0x246   :  { %v490_v10 = vmax.f32 %v436_v5, 0.0  ;;  %v2152_v13 = vpop.f32.mrb[8].mxu1  ;;  %v550_v14 = vpack.c.bf16 %v537_v53, %v536_v1  ;;  %v1789_v5 = vunpack.c.h.bf16 %v1867_v47 }
 0x247   :  { %v539_v15 = vadd.f32 %v1773_v59, %v491_v8  ;;  %v451_v16 = vadd.f32 %v2152_v13, %v2893_v12  ;;  %v445_v19 = vpop.f32.mrb[9].mxu1 }
 0x248   :  { %v538_v20 = vadd.f32 %v1772_v6, %v490_v10  ;;  %v446_v21 = vadd.f32 %v445_v19, %v2893_v12  ;;  %2182 = vmatprep.mubr.bf16.mxu0 %v550_v14  ;;  %v1788_v10 = vunpack.c.l.bf16 %v1867_v47 }
 0x249   :  { %v493_v24 = vmax.f32 %v451_v16, 0.0 }
 0x24a   :  { %v492_v25 = vmax.f32 %v446_v21, 0.0  ;;  %v2155_v26 = vpop.f32.mrb[10].mxu1  ;;  %v551_v27 = vpack.c.bf16 %v539_v15, %v538_v20  ;;  %v2587_v20 = vld [vmem:[#allocation7 + $0x80] sm:$0xff]   ;;  %v2588_v21 = vld [vmem:[#allocation7 + $0x88] sm:$0xff]  }
 0x24b   :  { %v541_v28 = vadd.f32 %v1777_v18, %v493_v24  ;;  %v461_v29 = vadd.f32 %v2155_v26, %v2893_v12  ;;  %v455_v31 = vpop.f32.mrb[11].mxu1  ;;  %2250 = vmatprep.subr.bf16.mxu0 %v2587_v20 }
 0x24c   :  { %v540_v32 = vadd.f32 %v1776_v22, %v492_v25  ;;  %v456_v33 = vadd.f32 %v455_v31, %v2893_v12  ;;  %2183 = vmatmul.mubr.bf16.gmra.mrb[20].mxu0 %v551_v27  ;;  %v2589_v22 = vld [vmem:[#allocation7 + $0x90] sm:$0xff]  }
 0x24d   :  { %v495_v36 = vmax.f32 %v461_v29, 0.0  ;;  %2251 = vmatpush3.bf16.msra.mxu0 %v2587_v20 }
 0x24e   :  { %v494_v37 = vmax.f32 %v456_v33, 0.0  ;;  %v2158_v38 = vpop.f32.mrb[12].mxu1  ;;  %v552_v39 = vpack.c.bf16 %v541_v28, %v540_v32  ;;  %2252 = vmatprep.subr.bf16.mxu0 %v2588_v21 }
 0x24f   :  { %v543_v40 = vadd.f32 %v1781_v30, %v495_v36  ;;  %v471_v41 = vadd.f32 %v2158_v38, %v2893_v12  ;;  %v465_v43 = vpop.f32.mrb[13].mxu1 }
 0x250   :  { %v542_v44 = vadd.f32 %v1780_v34, %v494_v37  ;;  %v466_v45 = vadd.f32 %v465_v43, %v2893_v12  ;;  %2186 = vmatprep.mubr.bf16.mxu0 %v552_v39 }
 0x251   :  { %v497_v50 = vmax.f32 %v471_v41, 0.0  ;;  %2253 = vmatpush3.bf16.msra.mxu0 %v2588_v21 }
 0x252   :  { %v496_v53 = vmax.f32 %v466_v45, 0.0  ;;  %v2161_v56 = vpop.f32.mrb[14].mxu1  ;;  %v553_v59 = vpack.c.bf16 %v543_v40, %v542_v44  ;;  %2254 = vmatprep.subr.bf16.mxu0 %v2589_v22 }
 0x253   :  { %v545_v62 = vadd.f32 %v1785_v42, %v497_v50  ;;  %v481_v1 = vadd.f32 %v2161_v56, %v2893_v12  ;;  %v475_v6 = vpop.f32.mrb[15].mxu1  ;;  %v2592_v50 = vld [vmem:[#allocation7 + $0xa8] sm:$0xff]   ;;  %v2594_v56 = vld [vmem:[#allocation7 + $0xb8] sm:$0xff]  }
 0x254   :  { %v544_v7 = vadd.f32 %v1784_v46, %v496_v53  ;;  %v476_v8 = vadd.f32 %v475_v6, %v2893_v12  ;;  %2187 = vmatmul.mubr.bf16.gmra.mrb[24].mxu0 %v553_v59  ;;  %v2591_v12 = vld [vmem:[#allocation7 + $0xa0] sm:$0xff]   ;;  %v2593_v53 = vld [vmem:[#allocation7 + $0xb0] sm:$0xff]   ;;  %v720_v59 = vsub.s32 1, %v2884_v9 }
 0x255   :  { %v499_v13 = vmax.f32 %v481_v1, 0.0  ;;  %2255 = vmatpush3.bf16.msra.mxu0 %v2589_v22  ;;  %v1791_v1 = vld [vmem:[#allocation8 + $0x40] sm:$0xff]  }
 0x256   :  { %v498_v14 = vmax.f32 %v476_v8, 0.0  ;;  %v554_v15 = vpack.c.bf16 %v545_v62, %v544_v7  ;;  %2256 = vmatprep.subr.bf16.mxu0 %v2590_v23  ;;  %v2929_v62 = vrot.slane %v2890_v11, %v720_v59  ;;  %v1793_v7 = vunpack.c.h.bf16 %v1791_v1 }
 0x257   :  { %v547_v16 = vadd.f32 %v1789_v5, %v499_v13  ;;  %v1792_v13 = vunpack.c.l.bf16 %v1791_v1 }
 0x258   :  { %v546_v18 = vadd.f32 %v1788_v10, %v498_v14  ;;  %2190 = vmatprep.mubr.bf16.mxu0 %v554_v15  ;;  %v1868_v14 = vld [vmem:[#allocation8 + $0x48] sm:$0xff]  }
 0x259   :  { %2257 = vmatpush3.bf16.msra.mxu0 %v2590_v23  ;;  %v1797_v21 = vunpack.c.h.bf16 %v1868_v14 }
 0x25a   :  { %v555_v19 = vpack.c.bf16 %v547_v16, %v546_v18  ;;  %2258 = vmatprep.subr.bf16.mxu0 %v2591_v12 }
 0x25c   :  { %2191 = vmatmul.mubr.bf16.gmra.mrb[28].mxu0 %v555_v19 }
 0x25d   :  { %2259 = vmatpush3.bf16.msra.mxu0 %v2591_v12 }
 0x25e   :  { %2260 = vmatprep.subr.bf16.mxu0 %v2592_v50 }
 0x261   :  { %2261 = vmatpush3.bf16.msra.mxu0 %v2592_v50 }
 0x262   :  { %2262 = vmatprep.subr.bf16.mxu0 %v2593_v53 }
 0x265   :  { %2263 = vmatpush3.bf16.msra.mxu0 %v2593_v53  ;;  %v1871_v53 = vld [vmem:[#allocation8 + $0x60] sm:$0xff]  }
 0x266   :  { %2264 = vmatprep.subr.bf16.mxu0 %v2594_v56 }
 0x269   :  { %2265 = vmatpush3.bf16.msra.mxu0 %v2594_v56 }
 0x317   :  { %v2180_v24 = vpop.f32.mrb[16].mxu0 }
 0x318   :  { %v655_v25 = vpop.f32.mrb[17].mxu0 }
 0x319   :  { %v2181_v26 = vpop.f32.mrb[18].mxu0 }
 0x31a   :  { %v2462_v27 = vpack.c.bf16 %v2181_v26, %v2180_v24  ;;  %v658_v28 = vpop.f32.mrb[19].mxu0  ;;  %v1796_v24 = vunpack.c.l.bf16 %v1868_v14 }
 0x31b   :  { %v2458_v29 = vpack.c.bf16 %v658_v28, %v655_v25  ;;  %v1869_v25 = vld [vmem:[#allocation8 + $0x50] sm:$0xff]  }
 0x31d   :  { %2459 = vmatprep.subr.bf16.mxu1 %v2458_v29 }
 0x31e   :  { %2461 = vmatpush3.bf16.msra.mxu1 %v2458_v29 }
 0x31f   :  { %v2184_v30 = vpop.f32.mrb[20].mxu0  ;;  %2463 = vmatprep.subr.bf16.mxu1 %v2462_v27 }
 0x320   :  { %v671_v31 = vpop.f32.mrb[21].mxu0 }
 0x321   :  { %v2185_v32 = vpop.f32.mrb[22].mxu0 }
 0x322   :  { %v2470_v33 = vpack.c.bf16 %v2185_v32, %v2184_v30  ;;  %v674_v34 = vpop.f32.mrb[23].mxu0  ;;  %2465 = vmatpush3.bf16.msra.mxu1 %v2462_v27  ;;  %v1801_v32 = vunpack.c.h.bf16 %v1869_v25 }
 0x323   :  { %v2466_v35 = vpack.c.bf16 %v674_v34, %v671_v31 }
 0x325   :  { %2467 = vmatprep.subr.bf16.mxu1 %v2466_v35 }
 0x326   :  { %2469 = vmatpush3.bf16.msra.mxu1 %v2466_v35 }
 0x327   :  { %v2188_v36 = vpop.f32.mrb[24].mxu0  ;;  %2471 = vmatprep.subr.bf16.mxu1 %v2470_v33 }
 0x328   :  { %v687_v37 = vpop.f32.mrb[25].mxu0 }
 0x329   :  { %v2189_v38 = vpop.f32.mrb[26].mxu0 }
 0x32a   :  { %v2478_v39 = vpack.c.bf16 %v2189_v38, %v2188_v36  ;;  %v690_v40 = vpop.f32.mrb[27].mxu0  ;;  %2473 = vmatpush3.bf16.msra.mxu1 %v2470_v33  ;;  %v1800_v36 = vunpack.c.l.bf16 %v1869_v25 }
 0x32b   :  { %v2474_v41 = vpack.c.bf16 %v690_v40, %v687_v37  ;;  %v1870_v37 = vld [vmem:[#allocation8 + $0x58] sm:$0xff]  }
 0x32c   :  { %v1804_v50 = vunpack.c.l.bf16 %v1870_v37 }
 0x32d   :  { %2475 = vmatprep.subr.bf16.mxu1 %v2474_v41 }
 0x32e   :  { %2477 = vmatpush3.bf16.msra.mxu1 %v2474_v41 }
 0x32f   :  { %v2192_v42 = vpop.f32.mrb[28].mxu0  ;;  %2479 = vmatprep.subr.bf16.mxu1 %v2478_v39 }
 0x330   :  { %v703_v43 = vpop.f32.mrb[29].mxu0 }
 0x331   :  { %v2193_v44 = vpop.f32.mrb[30].mxu0 }
 0x332   :  { %v2486_v45 = vpack.c.bf16 %v2193_v44, %v2192_v42  ;;  %v706_v46 = vpop.f32.mrb[31].mxu0  ;;  %2481 = vmatpush3.bf16.msra.mxu1 %v2478_v39  ;;  %v1805_v44 = vunpack.c.h.bf16 %v1870_v37 }
 0x333   :  { %v2482_v47 = vpack.c.bf16 %v706_v46, %v703_v43 }
 0x335   :  { %2483 = vmatprep.subr.bf16.mxu1 %v2482_v47 }
 0x336   :  { %2485 = vmatpush3.bf16.msra.mxu1 %v2482_v47 }
 0x337   :  { %2487 = vmatprep.subr.bf16.mxu1 %v2486_v45 }
 0x33a   :  { %2489 = vmatpush3.bf16.msra.mxu1 %v2486_v45 }
 0x33d   :  { %2227 = vmatmul.mubr.f32.vlgmr.msra.gmra.mrb[16].mxu1 %v2838_v48 }
 0x33e   :  { %2229 = vmatprep.mubr.f32.mxu1 %v2840_v49 }
 0x341   :  { %2230 = vmatmul.mubr.f32.gmra.mrb[18].mxu1 %v2843_v51 }
 0x342   :  { %2232 = vmatprep.mubr.f32.mxu1 %v2846_v52 }
 0x345   :  { %2233 = vmatmul.mubr.f32.gmra.mrb[20].mxu1 %v2849_v54 }
 0x346   :  { %2235 = vmatprep.mubr.f32.mxu1 %v2852_v55 }
 0x349   :  { %2236 = vmatmul.mubr.f32.gmra.mrb[22].mxu1 %v2855_v57 }
 0x34a   :  { %2238 = vmatprep.mubr.f32.mxu1 %v2858_v58 }
 0x34d   :  { %2239 = vmatmul.mubr.f32.gmra.mrb[24].mxu1 %v2861_v60 }
 0x34e   :  { %2241 = vmatprep.mubr.f32.mxu1 %v2864_v61 }
 0x351   :  { %2242 = vmatmul.mubr.f32.gmra.mrb[26].mxu1 %v2867_v63 }
 0x352   :  { %2244 = vmatprep.mubr.f32.mxu1 %v2870_v0 }
 0x355   :  { %2245 = vmatmul.mubr.f32.gmra.mrb[28].mxu1 %v2873_v2 }
 0x356   :  { %2247 = vmatprep.mubr.f32.mxu1 %v2876_v3 }
 0x359   :  { %2248 = vmatmul.mubr.f32.gmra.mrb[30].mxu1 %v2879_v4 }
 0x35a   :  { %2314 = vmatprep.mubr.f32.mxu1 %v2835_v17 }
 0x410   :  { %v2228_v5 = vpop.f32.mrb[16].mxu1 }
 0x411   :  { %v794_v6 = vadd.f32 %v2228_v5, %v2929_v62  ;;  %v788_v8 = vpop.f32.mrb[17].mxu1 }
 0x412   :  { %v789_v10 = vadd.f32 %v788_v8, %v2929_v62  ;;  %v1809_v8 = vunpack.c.h.bf16 %v1871_v53 }
 0x413   :  { %v868_v15 = vmax.f32 %v794_v6, 0.0 }
 0x414   :  { %v867_v16 = vmax.f32 %v789_v10, 0.0  ;;  %v2231_v18 = vpop.f32.mrb[18].mxu1 }
 0x415   :  { %v917_v19 = vadd.f32 %v1793_v7, %v868_v15  ;;  %v804_v20 = vadd.f32 %v2231_v18, %v2929_v62  ;;  %v798_v22 = vpop.f32.mrb[19].mxu1  ;;  %v1808_v15 = vunpack.c.l.bf16 %v1871_v53 }
 0x416   :  { %v916_v23 = vadd.f32 %v1792_v13, %v867_v16  ;;  %v799_v12 = vadd.f32 %v798_v22, %v2929_v62  ;;  %v1872_v16 = vld [vmem:[#allocation8 + $0x68] sm:$0xff]  }
 0x417   :  { %v870_v26 = vmax.f32 %v804_v20, 0.0 }
 0x418   :  { %v869_v27 = vmax.f32 %v799_v12, 0.0  ;;  %v2234_v28 = vpop.f32.mrb[20].mxu1  ;;  %v932_v29 = vpack.c.bf16 %v917_v19, %v916_v23  ;;  %v1813_v12 = vunpack.c.h.bf16 %v1872_v16 }
 0x419   :  { %v919_v30 = vadd.f32 %v1797_v21, %v870_v26  ;;  %v814_v31 = vadd.f32 %v2234_v28, %v2929_v62  ;;  %v808_v33 = vpop.f32.mrb[21].mxu1  ;;  %v1873_v28 = vld [vmem:[#allocation8 + $0x70] sm:$0xff]  }
 0x41a   :  { %v918_v34 = vadd.f32 %v1796_v24, %v869_v27  ;;  %v809_v35 = vadd.f32 %v808_v33, %v2929_v62  ;;  %2266 = vmatprep.mubr.bf16.mxu0 %v932_v29  ;;  %v1812_v27 = vunpack.c.l.bf16 %v1872_v16  ;;  %v2598_v16 = vld [vmem:[#allocation7 + $0xd8] sm:$0xff]  }
 0x41b   :  { %v872_v38 = vmax.f32 %v814_v31, 0.0 }
 0x41c   :  { %v933_v39 = vpack.c.bf16 %v919_v30, %v918_v34  ;;  %v871_v40 = vmax.f32 %v809_v35, 0.0  ;;  %v2237_v41 = vpop.f32.mrb[22].mxu1  ;;  %v1817_v35 = vunpack.c.h.bf16 %v1873_v28 }
 0x41d   :  { %v921_v42 = vadd.f32 %v1801_v32, %v872_v38  ;;  %v824_v43 = vadd.f32 %v2237_v41, %v2929_v62  ;;  %v818_v45 = vpop.f32.mrb[23].mxu1 }
 0x41e   :  { %v920_v46 = vadd.f32 %v1800_v36, %v871_v40  ;;  %v819_v47 = vadd.f32 %v818_v45, %v2929_v62  ;;  %2267 = vmatmul.mubr.bf16.vlgmr.msra.gmra.mrb[32].mxu0 %v933_v39  ;;  %v1816_v39 = vunpack.c.l.bf16 %v1873_v28  ;;  %v1874_v40 = vld [vmem:[#allocation8 + $0x78] sm:$0xff]  }
 0x41f   :  { %v874_v56 = vmax.f32 %v824_v43, 0.0 }
 0x420   :  { %v873_v59 = vmax.f32 %v819_v47, 0.0  ;;  %v2240_v1 = vpop.f32.mrb[24].mxu1  ;;  %v934_v5 = vpack.c.bf16 %v921_v42, %v920_v46  ;;  %v1821_v47 = vunpack.c.h.bf16 %v1874_v40 }
 0x421   :  { %v923_v6 = vadd.f32 %v1805_v44, %v874_v56  ;;  %v834_v7 = vadd.f32 %v2240_v1, %v2929_v62  ;;  %v828_v10 = vpop.f32.mrb[25].mxu1 }
 0x422   :  { %v922_v13 = vadd.f32 %v1804_v50, %v873_v59  ;;  %v829_v14 = vadd.f32 %v828_v10, %v2929_v62  ;;  %2270 = vmatprep.mubr.bf16.mxu0 %v934_v5  ;;  %v1820_v59 = vunpack.c.l.bf16 %v1874_v40 }
 0x423   :  { %v876_v18 = vmax.f32 %v834_v7, 0.0 }
 0x424   :  { %v875_v19 = vmax.f32 %v829_v14, 0.0  ;;  %v2243_v20 = vpop.f32.mrb[26].mxu1  ;;  %v935_v21 = vpack.c.bf16 %v923_v6, %v922_v13  ;;  %v2595_v13 = vld [vmem:[#allocation7 + $0xc0] sm:$0xff]   ;;  %v2596_v14 = vld [vmem:[#allocation7 + $0xc8] sm:$0xff]  }
 0x425   :  { %v925_v22 = vadd.f32 %v1809_v8, %v876_v18  ;;  %v844_v23 = vadd.f32 %v2243_v20, %v2929_v62  ;;  %v838_v24 = vpop.f32.mrb[27].mxu1  ;;  %2338 = vmatprep.subr.bf16.mxu0 %v2595_v13 }
 0x426   :  { %v924_v25 = vadd.f32 %v1808_v15, %v875_v19  ;;  %v839_v26 = vadd.f32 %v838_v24, %v2929_v62  ;;  %2271 = vmatmul.mubr.bf16.gmra.mrb[36].mxu0 %v935_v21  ;;  %v2597_v15 = vld [vmem:[#allocation7 + $0xd0] sm:$0xff]  }
 0x427   :  { %v878_v29 = vmax.f32 %v844_v23, 0.0  ;;  %2339 = vmatpush3.bf16.msra.mxu0 %v2595_v13 }
 0x428   :  { %v877_v30 = vmax.f32 %v839_v26, 0.0  ;;  %v2246_v31 = vpop.f32.mrb[28].mxu1  ;;  %v936_v32 = vpack.c.bf16 %v925_v22, %v924_v25  ;;  %2340 = vmatprep.subr.bf16.mxu0 %v2596_v14 }
 0x429   :  { %v927_v33 = vadd.f32 %v1813_v12, %v878_v29  ;;  %v854_v34 = vadd.f32 %v2246_v31, %v2929_v62  ;;  %v848_v36 = vpop.f32.mrb[29].mxu1 }
 0x42a   :  { %v926_v37 = vadd.f32 %v1812_v27, %v877_v30  ;;  %v849_v38 = vadd.f32 %v848_v36, %v2929_v62  ;;  %2274 = vmatprep.mubr.bf16.mxu0 %v936_v32 }
 0x42b   :  { %v880_v41 = vmax.f32 %v854_v34, 0.0  ;;  %2341 = vmatpush3.bf16.msra.mxu0 %v2596_v14 }
 0x42c   :  { %v879_v42 = vmax.f32 %v849_v38, 0.0  ;;  %v2249_v43 = vpop.f32.mrb[30].mxu1  ;;  %v937_v44 = vpack.c.bf16 %v927_v33, %v926_v37  ;;  %2342 = vmatprep.subr.bf16.mxu0 %v2597_v15 }
 0x42d   :  { %v929_v45 = vadd.f32 %v1817_v35, %v880_v41  ;;  %v864_v46 = vadd.f32 %v2249_v43, %v2929_v62  ;;  %v858_v50 = vpop.f32.mrb[31].mxu1  ;;  %v2600_v41 = vld [vmem:[#allocation7 + $0xe8] sm:$0xff]   ;;  %v2602_v43 = vld [vmem:[#allocation7 + $0xf8] sm:$0xff]  }
 0x42e   :  { %v928_v53 = vadd.f32 %v1816_v39, %v879_v42  ;;  %v859_v56 = vadd.f32 %v858_v50, %v2929_v62  ;;  %2275 = vmatmul.mubr.bf16.gmra.mrb[40].mxu0 %v937_v44  ;;  %v2599_v62 = vld [vmem:[#allocation7 + $0xe0] sm:$0xff]   ;;  %v2601_v42 = vld [vmem:[#allocation7 + $0xf0] sm:$0xff]   ;;  %v1104_v44 = vsub.s32 2, %v2884_v9 }
 0x42f   :  { %v882_v1 = vmax.f32 %v864_v46, 0.0  ;;  %2343 = vmatpush3.bf16.msra.mxu0 %v2597_v15  ;;  %v1823_v46 = vld [vmem:[#allocation8 + $0x80] sm:$0xff]  }
 0x430   :  { %v881_v5 = vmax.f32 %v859_v56, 0.0  ;;  %v938_v6 = vpack.c.bf16 %v929_v45, %v928_v53  ;;  %2344 = vmatprep.subr.bf16.mxu0 %v2598_v16  ;;  %v2965_v45 = vrot.slane %v2890_v11, %v1104_v44  ;;  %v1825_v53 = vunpack.c.h.bf16 %v1823_v46 }
 0x431   :  { %v931_v7 = vadd.f32 %v1821_v47, %v882_v1  ;;  %v1875_v1 = vld [vmem:[#allocation8 + $0x88] sm:$0xff]  }
 0x432   :  { %v930_v8 = vadd.f32 %v1820_v59, %v881_v5  ;;  %2278 = vmatprep.mubr.bf16.mxu0 %v938_v6  ;;  %v1824_v59 = vunpack.c.l.bf16 %v1823_v46  ;;  %v1829_v13 = vunpack.c.h.bf16 %v1875_v1 }
 0x433   :  { %2345 = vmatpush3.bf16.msra.mxu0 %v2598_v16  ;;  %v1828_v16 = vunpack.c.l.bf16 %v1875_v1  ;;  %v1879_v1 = vld [vmem:[#allocation8 + $0xa8] sm:$0xff]  }
 0x434   :  { %v939_v10 = vpack.c.bf16 %v931_v7, %v930_v8  ;;  %2346 = vmatprep.subr.bf16.mxu0 %v2599_v62 }
 0x436   :  { %2279 = vmatmul.mubr.bf16.gmra.mrb[44].mxu0 %v939_v10 }
 0x437   :  { %2347 = vmatpush3.bf16.msra.mxu0 %v2599_v62  ;;  %v1876_v62 = vld [vmem:[#allocation8 + $0x90] sm:$0xff]  }
 0x438   :  { %2348 = vmatprep.subr.bf16.mxu0 %v2600_v41 }
 0x43b   :  { %2349 = vmatpush3.bf16.msra.mxu0 %v2600_v41 }
 0x43c   :  { %2350 = vmatprep.subr.bf16.mxu0 %v2601_v42 }
 0x43f   :  { %2351 = vmatpush3.bf16.msra.mxu0 %v2601_v42 }
 0x440   :  { %2352 = vmatprep.subr.bf16.mxu0 %v2602_v43 }
 0x443   :  { %2353 = vmatpush3.bf16.msra.mxu0 %v2602_v43 }
 0x4f1   :  { %v2268_v18 = vpop.f32.mrb[32].mxu0 }
 0x4f2   :  { %v1039_v19 = vpop.f32.mrb[33].mxu0 }
 0x4f3   :  { %v2269_v20 = vpop.f32.mrb[34].mxu0 }
 0x4f4   :  { %v2494_v21 = vpack.c.bf16 %v2269_v20, %v2268_v18  ;;  %v1042_v22 = vpop.f32.mrb[35].mxu0 }
 0x4f5   :  { %v2490_v23 = vpack.c.bf16 %v1042_v22, %v1039_v19 }
 0x4f7   :  { %2491 = vmatprep.subr.bf16.mxu1 %v2490_v23 }
 0x4f8   :  { %2493 = vmatpush3.bf16.msra.mxu1 %v2490_v23 }
 0x4f9   :  { %v2272_v12 = vpop.f32.mrb[36].mxu0  ;;  %2495 = vmatprep.subr.bf16.mxu1 %v2494_v21 }
 0x4fa   :  { %v1055_v24 = vpop.f32.mrb[37].mxu0 }
 0x4fb   :  { %v2273_v25 = vpop.f32.mrb[38].mxu0 }
 0x4fc   :  { %v2502_v26 = vpack.c.bf16 %v2273_v25, %v2272_v12  ;;  %v1058_v27 = vpop.f32.mrb[39].mxu0  ;;  %2497 = vmatpush3.bf16.msra.mxu1 %v2494_v21  ;;  %v1833_v12 = vunpack.c.h.bf16 %v1876_v62 }
 0x4fd   :  { %v2498_v28 = vpack.c.bf16 %v1058_v27, %v1055_v24  ;;  %v1832_v27 = vunpack.c.l.bf16 %v1876_v62  ;;  %v1844_v62 = vunpack.c.l.bf16 %v1879_v1 }
 0x4ff   :  { %2499 = vmatprep.subr.bf16.mxu1 %v2498_v28 }
 0x500   :  { %2501 = vmatpush3.bf16.msra.mxu1 %v2498_v28  ;;  %v1877_v28 = vld [vmem:[#allocation8 + $0x98] sm:$0xff]  }
 0x501   :  { %v2276_v29 = vpop.f32.mrb[40].mxu0  ;;  %2503 = vmatprep.subr.bf16.mxu1 %v2502_v26 }
 0x502   :  { %v1071_v30 = vpop.f32.mrb[41].mxu0 }
 0x503   :  { %v2277_v31 = vpop.f32.mrb[42].mxu0 }
 0x504   :  { %v2510_v32 = vpack.c.bf16 %v2277_v31, %v2276_v29  ;;  %v1074_v33 = vpop.f32.mrb[43].mxu0  ;;  %2505 = vmatpush3.bf16.msra.mxu1 %v2502_v26 }
 0x505   :  { %v2506_v34 = vpack.c.bf16 %v1074_v33, %v1071_v30 }
 0x507   :  { %2507 = vmatprep.subr.bf16.mxu1 %v2506_v34 }
 0x508   :  { %2509 = vmatpush3.bf16.msra.mxu1 %v2506_v34 }
 0x509   :  { %v2280_v35 = vpop.f32.mrb[44].mxu0  ;;  %2511 = vmatprep.subr.bf16.mxu1 %v2510_v32 }
 0x50a   :  { %v1087_v36 = vpop.f32.mrb[45].mxu0 }
 0x50b   :  { %v2281_v37 = vpop.f32.mrb[46].mxu0 }
 0x50c   :  { %v2518_v38 = vpack.c.bf16 %v2281_v37, %v2280_v35  ;;  %v1090_v39 = vpop.f32.mrb[47].mxu0  ;;  %2513 = vmatpush3.bf16.msra.mxu1 %v2510_v32  ;;  %v1837_v35 = vunpack.c.h.bf16 %v1877_v28 }
 0x50d   :  { %v2514_v40 = vpack.c.bf16 %v1090_v39, %v1087_v36  ;;  %v1836_v39 = vunpack.c.l.bf16 %v1877_v28 }
 0x50f   :  { %2515 = vmatprep.subr.bf16.mxu1 %v2514_v40 }
 0x510   :  { %2517 = vmatpush3.bf16.msra.mxu1 %v2514_v40  ;;  %v1878_v40 = vld [vmem:[#allocation8 + $0xa0] sm:$0xff]  }
 0x511   :  { %2519 = vmatprep.subr.bf16.mxu1 %v2518_v38 }
 0x514   :  { %2521 = vmatpush3.bf16.msra.mxu1 %v2518_v38 }
 0x517   :  { %2315 = vmatmul.mubr.f32.vlgmr.msra.gmra.mrb[32].mxu1 %v2838_v48 }
 0x518   :  { %2317 = vmatprep.mubr.f32.mxu1 %v2840_v49 }
 0x51b   :  { %2318 = vmatmul.mubr.f32.gmra.mrb[34].mxu1 %v2843_v51 }
 0x51c   :  { %2320 = vmatprep.mubr.f32.mxu1 %v2846_v52 }
 0x51f   :  { %2321 = vmatmul.mubr.f32.gmra.mrb[36].mxu1 %v2849_v54 }
 0x520   :  { %2323 = vmatprep.mubr.f32.mxu1 %v2852_v55 }
 0x523   :  { %2324 = vmatmul.mubr.f32.gmra.mrb[38].mxu1 %v2855_v57 }
 0x524   :  { %2326 = vmatprep.mubr.f32.mxu1 %v2858_v58 }
 0x527   :  { %2327 = vmatmul.mubr.f32.gmra.mrb[40].mxu1 %v2861_v60 }
 0x528   :  { %2329 = vmatprep.mubr.f32.mxu1 %v2864_v61 }
 0x52b   :  { %2330 = vmatmul.mubr.f32.gmra.mrb[42].mxu1 %v2867_v63 }
 0x52c   :  { %2332 = vmatprep.mubr.f32.mxu1 %v2870_v0 }
 0x52f   :  { %2333 = vmatmul.mubr.f32.gmra.mrb[44].mxu1 %v2873_v2 }
 0x530   :  { %2335 = vmatprep.mubr.f32.mxu1 %v2876_v3 }
 0x533   :  { %2336 = vmatmul.mubr.f32.gmra.mrb[46].mxu1 %v2879_v4 }
 0x534   :  { %2402 = vmatprep.mubr.f32.mxu1 %v2835_v17 }
 0x5ea   :  { %v2316_v47 = vpop.f32.mrb[32].mxu1 }
 0x5eb   :  { %v1178_v50 = vadd.f32 %v2316_v47, %v2965_v45  ;;  %v1172_v17 = vpop.f32.mrb[33].mxu1 }
 0x5ec   :  { %v1173_v56 = vadd.f32 %v1172_v17, %v2965_v45 }
 0x5ed   :  { %v1252_v5 = vmax.f32 %v1178_v50, 0.0  ;;  %v1841_v50 = vunpack.c.h.bf16 %v1878_v40 }
 0x5ee   :  { %v1251_v6 = vmax.f32 %v1173_v56, 0.0  ;;  %v2319_v7 = vpop.f32.mrb[34].mxu1 }
 0x5ef   :  { %v1301_v8 = vadd.f32 %v1825_v53, %v1252_v5  ;;  %v1188_v10 = vadd.f32 %v2319_v7, %v2965_v45  ;;  %v1182_v14 = vpop.f32.mrb[35].mxu1 }
 0x5f0   :  { %v1300_v11 = vadd.f32 %v1824_v59, %v1251_v6  ;;  %v1183_v15 = vadd.f32 %v1182_v14, %v2965_v45  ;;  %v1840_v59 = vunpack.c.l.bf16 %v1878_v40  ;;  %v1845_v14 = vunpack.c.h.bf16 %v1879_v1 }
 0x5f1   :  { %v1254_v18 = vmax.f32 %v1188_v10, 0.0 }
 0x5f2   :  { %v1253_v19 = vmax.f32 %v1183_v15, 0.0  ;;  %v2322_v20 = vpop.f32.mrb[36].mxu1  ;;  %v1316_v21 = vpack.c.bf16 %v1301_v8, %v1300_v11 }
 0x5f3   :  { %v1303_v22 = vadd.f32 %v1829_v13, %v1254_v18  ;;  %v1198_v23 = vadd.f32 %v2322_v20, %v2965_v45  ;;  %v1192_v24 = vpop.f32.mrb[37].mxu1  ;;  %v1880_v18 = vld [vmem:[#allocation8 + $0xb0] sm:$0xff]  }
 0x5f4   :  { %v1302_v25 = vadd.f32 %v1828_v16, %v1253_v19  ;;  %v1193_v26 = vadd.f32 %v1192_v24, %v2965_v45  ;;  %2354 = vmatprep.mubr.bf16.mxu0 %v1316_v21  ;;  %v1849_v24 = vunpack.c.h.bf16 %v1880_v18  ;;  %v1848_v28 = vunpack.c.l.bf16 %v1880_v18 }
 0x5f5   :  { %v1256_v29 = vmax.f32 %v1198_v23, 0.0 }
 0x5f6   :  { %v1317_v30 = vpack.c.bf16 %v1303_v22, %v1302_v25  ;;  %v1255_v31 = vmax.f32 %v1193_v26, 0.0  ;;  %v2325_v32 = vpop.f32.mrb[38].mxu1 }
 0x5f7   :  { %v1305_v33 = vadd.f32 %v1833_v12, %v1256_v29  ;;  %v1208_v34 = vadd.f32 %v2325_v32, %v2965_v45  ;;  %v1202_v36 = vpop.f32.mrb[39].mxu1  ;;  %v1881_v29 = vld [vmem:[#allocation8 + $0xb8] sm:$0xff]  }
 0x5f8   :  { %v1304_v37 = vadd.f32 %v1832_v27, %v1255_v31  ;;  %v1203_v38 = vadd.f32 %v1202_v36, %v2965_v45  ;;  %2355 = vmatmul.mubr.bf16.vlgmr.msra.gmra.mrb[48].mxu0 %v1317_v30  ;;  %v1853_v36 = vunpack.c.h.bf16 %v1881_v29  ;;  %v1852_v40 = vunpack.c.l.bf16 %v1881_v29 }
 0x5f9   :  { %v1258_v41 = vmax.f32 %v1208_v34, 0.0 }
 0x5fa   :  { %v1257_v42 = vmax.f32 %v1203_v38, 0.0  ;;  %v2328_v43 = vpop.f32.mrb[40].mxu1  ;;  %v1318_v44 = vpack.c.bf16 %v1305_v33, %v1304_v37 }
 0x5fb   :  { %v1307_v46 = vadd.f32 %v1837_v35, %v1258_v41  ;;  %v1218_v47 = vadd.f32 %v2328_v43, %v2965_v45  ;;  %v1212_v53 = vpop.f32.mrb[41].mxu1 }
 0x5fc   :  { %v1306_v17 = vadd.f32 %v1836_v39, %v1257_v42  ;;  %v1213_v56 = vadd.f32 %v1212_v53, %v2965_v45  ;;  %2358 = vmatprep.mubr.bf16.mxu0 %v1318_v44 }
 0x5fd   :  { %v1260_v5 = vmax.f32 %v1218_v47, 0.0 }
 0x5fe   :  { %v1259_v6 = vmax.f32 %v1213_v56, 0.0  ;;  %v2331_v7 = vpop.f32.mrb[42].mxu1  ;;  %v1319_v8 = vpack.c.bf16 %v1307_v46, %v1306_v17 }
 0x5ff   :  { %v1309_v10 = vadd.f32 %v1841_v50, %v1260_v5  ;;  %v1228_v13 = vadd.f32 %v2331_v7, %v2965_v45  ;;  %v1222_v11 = vpop.f32.mrb[43].mxu1 }
 0x600   :  { %v1308_v15 = vadd.f32 %v1840_v59, %v1259_v6  ;;  %v1223_v16 = vadd.f32 %v1222_v11, %v2965_v45  ;;  %2359 = vmatmul.mubr.bf16.gmra.mrb[52].mxu0 %v1319_v8 }
 0x601   :  { %v1262_v19 = vmax.f32 %v1228_v13, 0.0 }
 0x602   :  { %v1261_v20 = vmax.f32 %v1223_v16, 0.0  ;;  %v2334_v21 = vpop.f32.mrb[44].mxu1  ;;  %v1320_v22 = vpack.c.bf16 %v1309_v10, %v1308_v15 }
 0x603   :  { %v1311_v23 = vadd.f32 %v1845_v14, %v1262_v19  ;;  %v1238_v12 = vadd.f32 %v2334_v21, %v2965_v45  ;;  %v1232_v25 = vpop.f32.mrb[45].mxu1 }
 0x604   :  { %v1310_v26 = vadd.f32 %v1844_v62, %v1261_v20  ;;  %v1233_v27 = vadd.f32 %v1232_v25, %v2965_v45  ;;  %2362 = vmatprep.mubr.bf16.mxu0 %v1320_v22 }
 0x605   :  { %v1264_v30 = vmax.f32 %v1238_v12, 0.0 }
 0x606   :  { %v1263_v31 = vmax.f32 %v1233_v27, 0.0  ;;  %v2337_v32 = vpop.f32.mrb[46].mxu1  ;;  %v1321_v33 = vpack.c.bf16 %v1311_v23, %v1310_v26 }
 0x607   :  { %v1313_v34 = vadd.f32 %v1849_v24, %v1264_v30  ;;  %v1248_v35 = vadd.f32 %v2337_v32, %v2965_v45  ;;  %v1242_v37 = vpop.f32.mrb[47].mxu1 }
 0x608   :  { %v1312_v38 = vadd.f32 %v1848_v28, %v1263_v31  ;;  %v1243_v39 = vadd.f32 %v1242_v37, %v2965_v45  ;;  %2363 = vmatmul.mubr.bf16.gmra.mrb[56].mxu0 %v1321_v33 }
 0x609   :  { %v1266_v41 = vmax.f32 %v1248_v35, 0.0 }
 0x60a   :  { %v1265_v42 = vmax.f32 %v1243_v39, 0.0  ;;  %v1322_v43 = vpack.c.bf16 %v1313_v34, %v1312_v38 }
 0x60b   :  { %v1315_v44 = vadd.f32 %v1853_v36, %v1266_v41 }
 0x60c   :  { %v1314_v46 = vadd.f32 %v1852_v40, %v1265_v42  ;;  %2366 = vmatprep.mubr.bf16.mxu0 %v1322_v43 }
 0x60e   :  { %v1323_v47 = vpack.c.bf16 %v1315_v44, %v1314_v46 }
 0x610   :  { %2367 = vmatmul.mubr.bf16.gmra.mrb[60].mxu0 %v1323_v47 }
 0x6cb   :  { %v2356_v50 = vpop.f32.mrb[48].mxu0 }
 0x6cc   :  { %v1423_v53 = vpop.f32.mrb[49].mxu0 }
 0x6cd   :  { %v2357_v17 = vpop.f32.mrb[50].mxu0 }
 0x6ce   :  { %v2526_v56 = vpack.c.bf16 %v2357_v17, %v2356_v50  ;;  %v1426_v59 = vpop.f32.mrb[51].mxu0 }
 0x6cf   :  { %v2522_v1 = vpack.c.bf16 %v1426_v59, %v1423_v53 }
 0x6d1   :  { %2523 = vmatprep.subr.bf16.mxu1 %v2522_v1 }
 0x6d2   :  { %2525 = vmatpush3.bf16.msra.mxu1 %v2522_v1 }
 0x6d3   :  { %v2360_v5 = vpop.f32.mrb[52].mxu0  ;;  %2527 = vmatprep.subr.bf16.mxu1 %v2526_v56 }
 0x6d4   :  { %v1439_v45 = vpop.f32.mrb[53].mxu0 }
 0x6d5   :  { %v2361_v6 = vpop.f32.mrb[54].mxu0 }
 0x6d6   :  { %v2534_v7 = vpack.c.bf16 %v2361_v6, %v2360_v5  ;;  %v1442_v8 = vpop.f32.mrb[55].mxu0  ;;  %2529 = vmatpush3.bf16.msra.mxu1 %v2526_v56 }
 0x6d7   :  { %v2530_v10 = vpack.c.bf16 %v1442_v8, %v1439_v45 }
 0x6d9   :  { %2531 = vmatprep.subr.bf16.mxu1 %v2530_v10 }
 0x6da   :  { %2533 = vmatpush3.bf16.msra.mxu1 %v2530_v10 }
 0x6db   :  { %v2364_v13 = vpop.f32.mrb[56].mxu0  ;;  %2535 = vmatprep.subr.bf16.mxu1 %v2534_v7 }
 0x6dc   :  { %v1455_v14 = vpop.f32.mrb[57].mxu0 }
 0x6dd   :  { %v2365_v11 = vpop.f32.mrb[58].mxu0 }
 0x6de   :  { %v2542_v15 = vpack.c.bf16 %v2365_v11, %v2364_v13  ;;  %v1458_v16 = vpop.f32.mrb[59].mxu0  ;;  %2537 = vmatpush3.bf16.msra.mxu1 %v2534_v7 }
 0x6df   :  { %v2538_v62 = vpack.c.bf16 %v1458_v16, %v1455_v14 }
 0x6e1   :  { %2539 = vmatprep.subr.bf16.mxu1 %v2538_v62 }
 0x6e2   :  { %2541 = vmatpush3.bf16.msra.mxu1 %v2538_v62 }
 0x6e3   :  { %v2368_v18 = vpop.f32.mrb[60].mxu0  ;;  %2543 = vmatprep.subr.bf16.mxu1 %v2542_v15 }
 0x6e4   :  { %v1471_v19 = vpop.f32.mrb[61].mxu0 }
 0x6e5   :  { %v2369_v20 = vpop.f32.mrb[62].mxu0 }
 0x6e6   :  { %v2550_v21 = vpack.c.bf16 %v2369_v20, %v2368_v18  ;;  %v1474_v22 = vpop.f32.mrb[63].mxu0  ;;  %2545 = vmatpush3.bf16.msra.mxu1 %v2542_v15 }
 0x6e7   :  { %v2546_v23 = vpack.c.bf16 %v1474_v22, %v1471_v19 }
 0x6e9   :  { %2547 = vmatprep.subr.bf16.mxu1 %v2546_v23 }
 0x6ea   :  { %2549 = vmatpush3.bf16.msra.mxu1 %v2546_v23 }
 0x6eb   :  { %2551 = vmatprep.subr.bf16.mxu1 %v2550_v21 }
 0x6ee   :  { %2553 = vmatpush3.bf16.msra.mxu1 %v2550_v21 }
 0x6f1   :  { %2403 = vmatmul.mubr.f32.vlgmr.msra.gmra.mrb[48].mxu1 %v2838_v48  ;;  %v1488_v48 = vsub.s32 3, %v2884_v9 }
 0x6f2   :  { %2405 = vmatprep.mubr.f32.mxu1 %v2840_v49  ;;  %v2603_v49 = vld [vmem:[%s3017_s3] sm:$0xf]  ;;  %s2728_s3 = smov [#allocation10]  }
 0x6f3   :  { %s1672_s17 = sshll.u32 %s2728_s3, 4  ;;  %s1673_s17 = int_to_ptr.vmem [resolvable:$true] %s1672_s17 }
 0x6f4   :  { %s2692_s18 = scalar_lea.vmem %s1673_s17, 2048  ;;  %p2697_p5 = scmp.lt.s32.totalorder %s1673_s17, %s1673_s17 }
 0x6f5   :  { %2406 = vmatmul.mubr.f32.gmra.mrb[50].mxu1 %v2843_v51  ;;  %v1489_v51 = vrot.slane %v2603_v49, %v1488_v48  ;;  %p2693_p4 = scmp.ne.s32.totalorder %s1673_s17, %s2692_s18  ;;  %p2698_p6 = scmp.lt.s32.totalorder %s2692_s18, %s2692_s18 }
 0x6f6   :  { %2408 = vmatprep.mubr.f32.mxu1 %v2846_v52 }
 0x6f7   :  { %p2699_p7 = por %p2698_p6, %p2697_p5 }
 0x6f9   :  { %2409 = vmatmul.mubr.f32.gmra.mrb[52].mxu1 %v2849_v54  ;;  %p2700_p8 = pnand %p2699_p7, %p2693_p4 }
 0x6fa   :  { %2411 = vmatprep.mubr.f32.mxu1 %v2852_v55 }
 0x6fd   :  { %2412 = vmatmul.mubr.f32.gmra.mrb[54].mxu1 %v2855_v57 }
 0x6fe   :  { %2414 = vmatprep.mubr.f32.mxu1 %v2858_v58 }
 0x701   :  { %2415 = vmatmul.mubr.f32.gmra.mrb[56].mxu1 %v2861_v60 }
 0x702   :  { %2417 = vmatprep.mubr.f32.mxu1 %v2864_v61 }
 0x705   :  { %2418 = vmatmul.mubr.f32.gmra.mrb[58].mxu1 %v2867_v63 }
 0x706   :  { %2420 = vmatprep.mubr.f32.mxu1 %v2870_v0 }
 0x709   :  { %2421 = vmatmul.mubr.f32.gmra.mrb[60].mxu1 %v2873_v2 }
 0x70a   :  { %2423 = vmatprep.mubr.f32.mxu1 %v2876_v3 }
 0x70d   :  { %2424 = vmatmul.mubr.f32.gmra.mrb[62].mxu1 %v2879_v4 }
 0x7c4   :  { %v2404_v52 = vpop.f32.mrb[48].mxu1 }
 0x7c5   :  { %v1562_v54 = vadd.f32 %v2404_v52, %v1489_v51  ;;  %v1556_v55 = vpop.f32.mrb[49].mxu1 }
 0x7c6   :  { %v1557_v57 = vadd.f32 %v1556_v55, %v1489_v51 }
 0x7c7   :  { %v1636_v58 = vmax.f32 %v1562_v54, 0.0 }
 0x7c8   :  { %v1635_v60 = vmax.f32 %v1557_v57, 0.0  ;;  %v2407_v61 = vpop.f32.mrb[50].mxu1 }
 0x7c9   :  { %1652 = vst [vmem:[#allocation10 + $0x8] sm:$0xff] %v1636_v58  ;;  %v1572_v63 = vadd.f32 %v2407_v61, %v1489_v51  ;;  %v1566_v0 = vpop.f32.mrb[51].mxu1 }
 0x7ca   :  { %1651 = vst [vmem:[#allocation10] sm:$0xff] %v1635_v60  ;;  %v1567_v2 = vadd.f32 %v1566_v0, %v1489_v51 }
 0x7cb   :  { %v1638_v3 = vmax.f32 %v1572_v63, 0.0 }
 0x7cc   :  { %v1637_v4 = vmax.f32 %v1567_v2, 0.0  ;;  %v2410_v9 = vpop.f32.mrb[52].mxu1 }
 0x7cd   :  { %1654 = vst [vmem:[#allocation10 + $0x18] sm:$0xff] %v1638_v3  ;;  %v1582_v12 = vadd.f32 %v2410_v9, %v1489_v51  ;;  %v1576_v24 = vpop.f32.mrb[53].mxu1 }
 0x7ce   :  { %1653 = vst [vmem:[#allocation10 + $0x10] sm:$0xff] %v1637_v4  ;;  %v1577_v25 = vadd.f32 %v1576_v24, %v1489_v51 }
 0x7cf   :  { %v1640_v26 = vmax.f32 %v1582_v12, 0.0 }
 0x7d0   :  { %v1639_v27 = vmax.f32 %v1577_v25, 0.0  ;;  %v2413_v28 = vpop.f32.mrb[54].mxu1 }
 0x7d1   :  { %1656 = vst [vmem:[#allocation10 + $0x28] sm:$0xff] %v1640_v26  ;;  %v1592_v29 = vadd.f32 %v2413_v28, %v1489_v51  ;;  %v1586_v30 = vpop.f32.mrb[55].mxu1 }
 0x7d2   :  { %1655 = vst [vmem:[#allocation10 + $0x20] sm:$0xff] %v1639_v27  ;;  %v1587_v31 = vadd.f32 %v1586_v30, %v1489_v51 }
 0x7d3   :  { %v1642_v32 = vmax.f32 %v1592_v29, 0.0 }
 0x7d4   :  { %v1641_v33 = vmax.f32 %v1587_v31, 0.0  ;;  %v2416_v34 = vpop.f32.mrb[56].mxu1 }
 0x7d5   :  { %1658 = vst [vmem:[#allocation10 + $0x38] sm:$0xff] %v1642_v32  ;;  %v1602_v35 = vadd.f32 %v2416_v34, %v1489_v51  ;;  %v1596_v36 = vpop.f32.mrb[57].mxu1 }
 0x7d6   :  { %1657 = vst [vmem:[#allocation10 + $0x30] sm:$0xff] %v1641_v33  ;;  %v1597_v37 = vadd.f32 %v1596_v36, %v1489_v51 }
 0x7d7   :  { %v1644_v38 = vmax.f32 %v1602_v35, 0.0 }
 0x7d8   :  { %v1643_v39 = vmax.f32 %v1597_v37, 0.0  ;;  %v2419_v40 = vpop.f32.mrb[58].mxu1 }
 0x7d9   :  { %1660 = vst [vmem:[#allocation10 + $0x48] sm:$0xff] %v1644_v38  ;;  %v1612_v41 = vadd.f32 %v2419_v40, %v1489_v51  ;;  %v1606_v42 = vpop.f32.mrb[59].mxu1 }
 0x7da   :  { %1659 = vst [vmem:[#allocation10 + $0x40] sm:$0xff] %v1643_v39  ;;  %v1607_v43 = vadd.f32 %v1606_v42, %v1489_v51 }
 0x7db   :  { %v1646_v44 = vmax.f32 %v1612_v41, 0.0 }
 0x7dc   :  { %v1645_v46 = vmax.f32 %v1607_v43, 0.0  ;;  %v2422_v47 = vpop.f32.mrb[60].mxu1 }
 0x7dd   :  { %1662 = vst [vmem:[#allocation10 + $0x58] sm:$0xff] %v1646_v44  ;;  %v1622_v50 = vadd.f32 %v2422_v47, %v1489_v51  ;;  %v1616_v53 = vpop.f32.mrb[61].mxu1 }
 0x7de   :  { %1661 = vst [vmem:[#allocation10 + $0x50] sm:$0xff] %v1645_v46  ;;  %v1617_v17 = vadd.f32 %v1616_v53, %v1489_v51 }
 0x7df   :  { %v1648_v56 = vmax.f32 %v1622_v50, 0.0 }
 0x7e0   :  { %v1647_v59 = vmax.f32 %v1617_v17, 0.0  ;;  %v2425_v1 = vpop.f32.mrb[62].mxu1 }
 0x7e1   :  { %1664 = vst [vmem:[#allocation10 + $0x68] sm:$0xff] %v1648_v56  ;;  %v1632_v5 = vadd.f32 %v2425_v1, %v1489_v51  ;;  %v1626_v45 = vpop.f32.mrb[63].mxu1 }
 0x7e2   :  { %1663 = vst [vmem:[#allocation10 + $0x60] sm:$0xff] %v1647_v59  ;;  %v1627_v6 = vadd.f32 %v1626_v45, %v1489_v51 }
 0x7e3   :  { %v1650_v7 = vmax.f32 %v1632_v5, 0.0 }
 0x7e4   :  { %v1649_v8 = vmax.f32 %v1627_v6, 0.0 }
 0x7e5   :  { %1666 = vst [vmem:[#allocation10 + $0x78] sm:$0xff] %v1650_v7 }
 0x7e6   :  { %1665 = vst [vmem:[#allocation10 + $0x70] sm:$0xff] %v1649_v8 }
 0x7e7   :  { %2703 = shalt.err (!%p2700_p8)
}
 0x7e8   :  { %s2704_s22 = scalar_lea.hbm %s3019_s5, 2048 }
 0x7e9   :  { %p2705_p9 = scmp.ne.s32.totalorder %s3019_s5, %s2704_s22  ;;  %p2708_p10 = scmp.lt.u32.totalorder %s2704_s22, %s3019_s5 }
 0x7eb   :  { %p2710_p11 = pnand %p2708_p10, %p2705_p9 }
 0x7ed   :  { %2713 = shalt.err (!%p2710_p11)
}
 0x7ee   :  { %s2729_s27 = smov 128   ;;  %s2730_s28 = smov 8  }
 0x7ef   :  { %1678 = dma.vmem_to_hbm [thread:$0]  %s1673_s17, 2048, %s3019_s5, [#allocation4], %s2729_s27, %s2729_s27, %s2730_s28  }
 0x7f0   :  { %2720 = dma.done.wait [#allocation4], 2048  }
 0x7f1   :  { %2721 = vsyncadd [#allocation4], 4294965248 }
 0x7f2   :  { %1682 = vsyncpa [#allocation3], 1 }
 0x7f3   :  { %1683 = vsyncpa [#allocation6], 1 }
 0x7f4   :  { %1684 = vsyncpa [#allocation9], 1 }
 0x7f5   :  { %1685 = vsyncpa [#allocation4], 1 }

</bundles_post_ra>
